<compile_context>
chip_gen: v7x
topology: tpu7x:2x2x1
jax: 0.10.0
libtpu: 0.0.40
codegen_flags: <defaults>
</compile_context>

<pallas_src>
import math
import functools

import jax
import jax.numpy as jnp
from jax.experimental import pallas as pl
from jax.experimental.pallas import tpu as pltpu


def _layer_norm(z, gamma, beta, eps=1e-5):
    mu = jnp.mean(z, axis=-1, keepdims=True)
    var = jnp.mean((z - mu) ** 2, axis=-1, keepdims=True)
    return (z - mu) * jax.lax.rsqrt(var + eps) * gamma + beta


def encoder_layer_kernel(
    x_q_ref, x_full_ref, mask_ref,
    wq_ref, bq_ref, wk_ref, bk_ref, wv_ref, bv_ref, wo_ref, bo_ref,
    w1_ref, b1_ref, w2_ref, b2_ref,
    g1_ref, be1_ref, g2_ref, be2_ref,
    out_ref, attn_ref,
    k_scr, v_scr, o_scr,
    *, num_heads, head_dim,
):
    qi = pl.program_id(1)

    # --- K/V projections: once per batch element, kept in bf16 VMEM scratch ---
    @pl.when(qi == 0)
    def _():
        xf = x_full_ref[0].astype(jnp.bfloat16)                           # (T, E)
        k = jnp.dot(xf, wk_ref[...], preferred_element_type=jnp.float32) + bk_ref[...]
        v = jnp.dot(xf, wv_ref[...], preferred_element_type=jnp.float32) + bv_ref[...]
        k_scr[...] = k.astype(jnp.bfloat16)
        v_scr[...] = v.astype(jnp.bfloat16)

    xq32 = x_q_ref[0].astype(jnp.float32)                                 # (TQ, E) residual path (f32)
    xq_bf = xq32.astype(jnp.bfloat16)

    # Q projection; fold 1/sqrt(D) into Q once (saves H*(TQ,T) VALU multiplies).
    scale = jnp.float32(1.0 / math.sqrt(head_dim))
    q = jnp.dot(xq_bf, wq_ref[...], preferred_element_type=jnp.float32) + bq_ref[...]
    qb = (q * scale).astype(jnp.bfloat16)                                 # (TQ, E)

    # Additive key-mask bias, hoisted out of the per-head loop.
    neg = jnp.where(mask_ref[0] == 0.0, jnp.float32(-1e9), jnp.float32(0.0))  # (1, T)

    kb = k_scr[...]                                                       # (T, E) bf16
    vb = v_scr[...]                                                       # (T, E) bf16

    for h in range(num_heads):                                            # static unroll
        lo = h * head_dim
        hi = lo + head_dim
        qh = qb[:, lo:hi]                                                 # (TQ, D)
        kh = kb[:, lo:hi]                                                 # (T, D)
        vh = vb[:, lo:hi]                                                 # (T, D)

        # Contract on D of both operands -> no materialized kh.T.
        scores = jax.lax.dot_general(
            qh, kh, (((1,), (1,)), ((), ())),
            preferred_element_type=jnp.float32) + neg                     # (TQ, T) f32

        m = jnp.max(scores, axis=-1, keepdims=True)
        e = jnp.exp(scores - m)
        l = jnp.sum(e, axis=-1, keepdims=True)
        p = e * pl.reciprocal(l, approx=True)                             # (TQ, T) f32

        attn_ref[0, h] = p.astype(attn_ref.dtype)
        # Head output written straight into the (TQ, E) slab (no concatenate).
        o_scr[:, lo:hi] = jnp.dot(p.astype(jnp.bfloat16), vh,
                                  preferred_element_type=jnp.float32)

    # Output projection + residual + LayerNorm 1
    o = jnp.dot(o_scr[...].astype(jnp.bfloat16), wo_ref[...],
                preferred_element_type=jnp.float32) + bo_ref[...]
    h1 = _layer_norm(xq32 + o, g1_ref[...], be1_ref[...])

    # FeedForward: Linear -> ReLU -> (Dropout == id) -> Linear
    ff = jnp.dot(h1.astype(jnp.bfloat16), w1_ref[...],
                 preferred_element_type=jnp.float32) + b1_ref[...]
    ff = jnp.maximum(ff, 0.0)
    ff = jnp.dot(ff.astype(jnp.bfloat16), w2_ref[...],
                 preferred_element_type=jnp.float32) + b2_ref[...]

    # Residual + LayerNorm 2
    y = _layer_norm(h1 + ff, g2_ref[...], be2_ref[...])
    out_ref[0] = y.astype(out_ref.dtype)


def _pick_tq(T):
    # Query-tile size: lane/sublane friendly, divides T; fall back to whole T.
    for cand in (128, 64, 32, 16):
        if T % cand == 0:
            return cand
    return T


def encoder_layer(x, attention_mask, params, *, num_heads, attn_dtype=jnp.bfloat16):
    B, T, E = x.shape
    H = num_heads
    assert E % H == 0
    D = E // H
    Hid = params["w1"].shape[0]  # 4*E

    TQ = _pick_tq(T)
    NQ = T // TQ

    # Linear weights pre-transposed to (in, out) and cast to bf16 (MXU operands);
    # biases / LayerNorm params stay f32.
    t = lambda w: jnp.asarray(w, jnp.float32).T.astype(jnp.bfloat16)
    r = lambda b: jnp.asarray(b, jnp.float32).reshape(1, -1)

    mask_f = jnp.asarray(attention_mask, jnp.float32).reshape(B, 1, T)
    x_f = jnp.asarray(x, jnp.float32)   # kept f32 for exact residual/LayerNorm path

    kernel = functools.partial(encoder_layer_kernel, num_heads=H, head_dim=D)

    full = lambda shape: pl.BlockSpec(shape, lambda b, qi: tuple(0 for _ in shape))

    grid_spec = pltpu.PrefetchScalarGridSpec(
        num_scalar_prefetch=0,
        grid=(B, NQ),
        in_specs=[
            pl.BlockSpec((1, TQ, E), lambda b, qi: (b, qi, 0)),      # x (query tile)
            pl.BlockSpec((1, T, E), lambda b, qi: (b, 0, 0)),        # x (full, for K/V)
            pl.BlockSpec((1, 1, T), lambda b, qi: (b, 0, 0)),        # mask
            full((E, E)), full((1, E)),                              # Wq, bq
            full((E, E)), full((1, E)),                              # Wk, bk
            full((E, E)), full((1, E)),                              # Wv, bv
            full((E, E)), full((1, E)),                              # Wo, bo
            full((E, Hid)), full((1, Hid)),                          # W1, b1
            full((Hid, E)), full((1, E)),                            # W2, b2
            full((1, E)), full((1, E)),                              # ln1 gamma/beta
            full((1, E)), full((1, E)),                              # ln2 gamma/beta
        ],
        out_specs=[
            pl.BlockSpec((1, TQ, E), lambda b, qi: (b, qi, 0)),          # y
            pl.BlockSpec((1, H, TQ, T), lambda b, qi: (b, 0, qi, 0)),    # attention
        ],
        scratch_shapes=[
            pltpu.VMEM((T, E), jnp.bfloat16),    # K (per batch element)
            pltpu.VMEM((T, E), jnp.bfloat16),    # V (per batch element)
            pltpu.VMEM((TQ, E), jnp.float32),    # head-concat output slab
        ],
    )

    attn_bytes = jnp.dtype(attn_dtype).itemsize
    cost = pl.CostEstimate(
        flops=(2 * B * T * E * E * 4            # Q, K, V, O projections
               + 2 * B * T * E * Hid * 2        # FFN
               + 2 * B * H * T * T * D * 2),    # QK^T and PV
        transcendentals=B * H * T * T,          # softmax exp
        bytes_accessed=(2 * B * T * E * 4                      # x (two views)
                        + (4 * E * E + 2 * E * Hid) * 2        # bf16 weights
                        + (7 * E + Hid) * 4                    # biases + LN params
                        + B * T * E * 4                        # y write
                        + B * H * T * T * attn_bytes),         # attention write
    )

    y, attn = pl.pallas_call(
        kernel,
        out_shape=(
            jax.ShapeDtypeStruct((B, T, E), jnp.float32),
            jax.ShapeDtypeStruct((B, H, T, T), attn_dtype),
        ),
        grid_spec=grid_spec,
        compiler_params=pltpu.CompilerParams(
            dimension_semantics=("parallel", "arbitrary")),
        cost_estimate=cost,
    )(
        x_f, x_f, mask_f,
        t(params["wq"]), r(params["bq"]),
        t(params["wk"]), r(params["bk"]),
        t(params["wv"]), r(params["bv"]),
        t(params["wo"]), r(params["bo"]),
        t(params["w1"]), r(params["b1"]),
        t(params["w2"]), r(params["b2"]),
        r(params["g1"]), r(params["be1"]),
        r(params["g2"]), r(params["be2"]),
    )
    return y, attn


def reference_encoder_layer(x, attention_mask, params, *, num_heads):
    # Pure-JAX f32 reference (mirrors the PyTorch module, eval-mode dropout).
    B, T, E = x.shape
    H = num_heads
    D = E // H
    lin = lambda z, w, b: z @ w.T + b
    q = lin(x, params["wq"], params["bq"]).reshape(B, T, H, D).transpose(0, 2, 1, 3)
    k = lin(x, params["wk"], params["bk"]).reshape(B, T, H, D).transpose(0, 2, 1, 3)
    v = lin(x, params["wv"], params["bv"]).reshape(B, T, H, D).transpose(0, 2, 1, 3)
    scores = jnp.einsum("bhqd,bhkd->bhqk", q, k) / math.sqrt(D)
    m = attention_mask[:, None, None, :]
    scores = jnp.where(m == 0, -1e9, scores)
    attn = jax.nn.softmax(scores, axis=-1)
    o = jnp.einsum("bhqk,bhkd->bhqd", attn, v).transpose(0, 2, 1, 3).reshape(B, T, E)
    o = lin(o, params["wo"], params["bo"])

    def ln(z, g, b):
        mu = z.mean(-1, keepdims=True)
        var = ((z - mu) ** 2).mean(-1, keepdims=True)
        return (z - mu) / jnp.sqrt(var + 1e-5) * g + b

    h1 = ln(x + o, params["g1"], params["be1"])
    ff = jnp.maximum(lin(h1, params["w1"], params["b1"]), 0.0)
    ff = lin(ff, params["w2"], params["b2"])
    y = ln(h1 + ff, params["g2"], params["be2"])
    return y, attn


if __name__ == "__main__":
    B, T, E, H = 2, 8, 32, 4
    Hid = 4 * E

    key = jax.random.PRNGKey(0)
    ks = jax.random.split(key, 16)
    s = 0.05
    params = {
        "wq": s * jax.random.normal(ks[0], (E, E), jnp.float32),
        "bq": s * jax.random.normal(ks[1], (E,), jnp.float32),
        "wk": s * jax.random.normal(ks[2], (E, E), jnp.float32),
        "bk": s * jax.random.normal(ks[3], (E,), jnp.float32),
        "wv": s * jax.random.normal(ks[4], (E, E), jnp.float32),
        "bv": s * jax.random.normal(ks[5], (E,), jnp.float32),
        "wo": s * jax.random.normal(ks[6], (E, E), jnp.float32),
        "bo": s * jax.random.normal(ks[7], (E,), jnp.float32),
        "w1": s * jax.random.normal(ks[8], (Hid, E), jnp.float32),
        "b1": s * jax.random.normal(ks[9], (Hid,), jnp.float32),
        "w2": s * jax.random.normal(ks[10], (E, Hid), jnp.float32),
        "b2": s * jax.random.normal(ks[11], (E,), jnp.float32),
        "g1": jnp.ones((E,), jnp.float32),
        "be1": jnp.zeros((E,), jnp.float32),
        "g2": jnp.ones((E,), jnp.float32),
        "be2": jnp.zeros((E,), jnp.float32),
    }

    x = jax.random.normal(ks[12], (B, T, E), jnp.float32)
    attention_mask = jnp.ones((B, T), jnp.int32).at[1, 6:].set(0)  # pad last 2 of batch 1

    y, attn = encoder_layer(x, attention_mask, params, num_heads=H)
    y = jax.block_until_ready(y)
    attn = jax.block_until_ready(attn)

    y_ref, attn_ref = reference_encoder_layer(x, attention_mask, params, num_heads=H)
    # bf16 matmul operands (f32 accumulation) + bf16 attention output, compared
    # against the pure-f32 reference => bf16-appropriate tolerances (per review).
    assert jnp.allclose(y, y_ref, atol=2e-2, rtol=2e-2), "output mismatch"
    assert jnp.allclose(attn.astype(jnp.float32), attn_ref, atol=1.5e-2, rtol=0.0), \
        "attention mismatch"

    print("KERNEL_OK")
</pallas_src>

<mosaic_0001>
module attributes {stable_mosaic.version = 11 : i64} {
  func.func @encoder_layer_kernel(%arg0: i32, %arg1: i32, %arg2: memref<1x8x32xf32, #tpu.memory_space<vmem>>, %arg3: memref<1x8x32xf32, #tpu.memory_space<vmem>>, %arg4: memref<1x1x8xf32, #tpu.memory_space<vmem>>, %arg5: memref<32x32xbf16, #tpu.memory_space<vmem>>, %arg6: memref<1x32xf32, #tpu.memory_space<vmem>>, %arg7: memref<32x32xbf16, #tpu.memory_space<vmem>>, %arg8: memref<1x32xf32, #tpu.memory_space<vmem>>, %arg9: memref<32x32xbf16, #tpu.memory_space<vmem>>, %arg10: memref<1x32xf32, #tpu.memory_space<vmem>>, %arg11: memref<32x32xbf16, #tpu.memory_space<vmem>>, %arg12: memref<1x32xf32, #tpu.memory_space<vmem>>, %arg13: memref<32x128xbf16, #tpu.memory_space<vmem>>, %arg14: memref<1x128xf32, #tpu.memory_space<vmem>>, %arg15: memref<128x32xbf16, #tpu.memory_space<vmem>>, %arg16: memref<1x32xf32, #tpu.memory_space<vmem>>, %arg17: memref<1x32xf32, #tpu.memory_space<vmem>>, %arg18: memref<1x32xf32, #tpu.memory_space<vmem>>, %arg19: memref<1x32xf32, #tpu.memory_space<vmem>>, %arg20: memref<1x32xf32, #tpu.memory_space<vmem>>, %arg21: memref<1x8x32xf32, #tpu.memory_space<vmem>>, %arg22: memref<1x4x8x8xbf16, #tpu.memory_space<vmem>>, %arg23: memref<8x32xbf16, #tpu.memory_space<vmem>>, %arg24: memref<8x32xbf16, #tpu.memory_space<vmem>>, %arg25: memref<8x32xf32, #tpu.memory_space<vmem>>) attributes {dimension_semantics = [#tpu.dimension_semantics<parallel>, #tpu.dimension_semantics<arbitrary>], iteration_bounds = array<i64: 2, 1>, scalar_prefetch = 0 : i64, scratch_operands = 3 : i64, tpu.core_type = #tpu.core_type<tc>, window_params = [{transform_indices = @transform_0, window_bounds = array<i64: 1, 8, 32>}, {transform_indices = @transform_1, window_bounds = array<i64: 1, 8, 32>}, {transform_indices = @transform_2, window_bounds = array<i64: 1, 1, 8>}, {pipeline_mode = #tpu.pipeline_mode<synchronous>, transform_indices = @transform_3, window_bounds = array<i64: 32, 32>}, {pipeline_mode = #tpu.pipeline_mode<synchronous>, transform_indices = @transform_4, window_bounds = array<i64: 1, 32>}, {pipeline_mode = #tpu.pipeline_mode<synchronous>, transform_indices = @transform_5, window_bounds = array<i64: 32, 32>}, {pipeline_mode = #tpu.pipeline_mode<synchronous>, transform_indices = @transform_6, window_bounds = array<i64: 1, 32>}, {pipeline_mode = #tpu.pipeline_mode<synchronous>, transform_indices = @transform_7, window_bounds = array<i64: 32, 32>}, {pipeline_mode = #tpu.pipeline_mode<synchronous>, transform_indices = @transform_8, window_bounds = array<i64: 1, 32>}, {pipeline_mode = #tpu.pipeline_mode<synchronous>, transform_indices = @transform_9, window_bounds = array<i64: 32, 32>}, {pipeline_mode = #tpu.pipeline_mode<synchronous>, transform_indices = @transform_10, window_bounds = array<i64: 1, 32>}, {pipeline_mode = #tpu.pipeline_mode<synchronous>, transform_indices = @transform_11, window_bounds = array<i64: 32, 128>}, {pipeline_mode = #tpu.pipeline_mode<synchronous>, transform_indices = @transform_12, window_bounds = array<i64: 1, 128>}, {pipeline_mode = #tpu.pipeline_mode<synchronous>, transform_indices = @transform_13, window_bounds = array<i64: 128, 32>}, {pipeline_mode = #tpu.pipeline_mode<synchronous>, transform_indices = @transform_14, window_bounds = array<i64: 1, 32>}, {pipeline_mode = #tpu.pipeline_mode<synchronous>, transform_indices = @transform_15, window_bounds = array<i64: 1, 32>}, {pipeline_mode = #tpu.pipeline_mode<synchronous>, transform_indices = @transform_16, window_bounds = array<i64: 1, 32>}, {pipeline_mode = #tpu.pipeline_mode<synchronous>, transform_indices = @transform_17, window_bounds = array<i64: 1, 32>}, {pipeline_mode = #tpu.pipeline_mode<synchronous>, transform_indices = @transform_18, window_bounds = array<i64: 1, 32>}, {transform_indices = @transform_19, window_bounds = array<i64: 1, 8, 32>}, {transform_indices = @transform_20, window_bounds = array<i64: 1, 4, 8, 8>}]} {
    %c0_i32 = arith.constant 0 : i32
    %0 = arith.cmpi eq, %arg1, %c0_i32 : i32
    %1 = arith.extui %0 : i1 to i32
    %c0_i32_0 = arith.constant 0 : i32
    %2 = arith.cmpi ne, %1, %c0_i32_0 : i32
    scf.if %2 {
      %c0_91 = arith.constant 0 : index
      %c0_92 = arith.constant 0 : index
      %c0_93 = arith.constant 0 : index
      %189 = vector.load %arg3[%c0_91, %c0_92, %c0_93] : memref<1x8x32xf32, #tpu.memory_space<vmem>>, vector<1x8x32xf32>
      %190 = vector.shape_cast %189 : vector<1x8x32xf32> to vector<8x32xf32>
      %191 = arith.truncf %190 : vector<8x32xf32> to vector<8x32xbf16>
      %c0_94 = arith.constant 0 : index
      %c0_95 = arith.constant 0 : index
      %192 = vector.load %arg7[%c0_94, %c0_95] : memref<32x32xbf16, #tpu.memory_space<vmem>>, vector<32x32xbf16>
      %cst_96 = arith.constant dense<0.000000e+00> : vector<8x32xf32>
      %193 = tpu.matmul %191, %192, %cst_96 {dimension_numbers = #tpu.dot_dimension_numbers<[1], [0], [0], [1], [0, 0, 1, 1], [], []>} : vector<8x32xbf16>, vector<32x32xbf16>, vector<8x32xf32> -> vector<8x32xf32>
      %c0_97 = arith.constant 0 : index
      %c0_98 = arith.constant 0 : index
      %194 = vector.load %arg8[%c0_97, %c0_98] : memref<1x32xf32, #tpu.memory_space<vmem>>, vector<1x32xf32>
      %195 = vector.broadcast %194 : vector<1x32xf32> to vector<8x32xf32>
      %196 = arith.addf %193, %195 : vector<8x32xf32>
      %c0_99 = arith.constant 0 : index
      %c0_100 = arith.constant 0 : index
      %197 = vector.load %arg9[%c0_99, %c0_100] : memref<32x32xbf16, #tpu.memory_space<vmem>>, vector<32x32xbf16>
      %cst_101 = arith.constant dense<0.000000e+00> : vector<8x32xf32>
      %198 = tpu.matmul %191, %197, %cst_101 {dimension_numbers = #tpu.dot_dimension_numbers<[1], [0], [0], [1], [0, 0, 1, 1], [], []>} : vector<8x32xbf16>, vector<32x32xbf16>, vector<8x32xf32> -> vector<8x32xf32>
      %c0_102 = arith.constant 0 : index
      %c0_103 = arith.constant 0 : index
      %199 = vector.load %arg10[%c0_102, %c0_103] : memref<1x32xf32, #tpu.memory_space<vmem>>, vector<1x32xf32>
      %200 = vector.broadcast %199 : vector<1x32xf32> to vector<8x32xf32>
      %201 = arith.addf %198, %200 : vector<8x32xf32>
      %202 = arith.truncf %196 : vector<8x32xf32> to vector<8x32xbf16>
      %c0_104 = arith.constant 0 : index
      %c0_105 = arith.constant 0 : index
      %203 = vector.load %arg23[%c0_104, %c0_105] : memref<8x32xbf16, #tpu.memory_space<vmem>>, vector<8x32xbf16>
      tpu.vector_store %arg23[%c0_104, %c0_105], %202 {strides = array<i32>} : memref<8x32xbf16, #tpu.memory_space<vmem>>, vector<8x32xbf16>,
      %204 = arith.truncf %201 : vector<8x32xf32> to vector<8x32xbf16>
      %c0_106 = arith.constant 0 : index
      %c0_107 = arith.constant 0 : index
      %205 = vector.load %arg24[%c0_106, %c0_107] : memref<8x32xbf16, #tpu.memory_space<vmem>>, vector<8x32xbf16>
      tpu.vector_store %arg24[%c0_106, %c0_107], %204 {strides = array<i32>} : memref<8x32xbf16, #tpu.memory_space<vmem>>, vector<8x32xbf16>,
    } else {
    }
    %c0 = arith.constant 0 : index
    %c0_1 = arith.constant 0 : index
    %c0_2 = arith.constant 0 : index
    %3 = vector.load %arg2[%c0, %c0_1, %c0_2] : memref<1x8x32xf32, #tpu.memory_space<vmem>>, vector<1x8x32xf32>
    %4 = vector.shape_cast %3 : vector<1x8x32xf32> to vector<8x32xf32>
    %5 = arith.truncf %4 : vector<8x32xf32> to vector<8x32xbf16>
    %c0_3 = arith.constant 0 : index
    %c0_4 = arith.constant 0 : index
    %6 = vector.load %arg5[%c0_3, %c0_4] : memref<32x32xbf16, #tpu.memory_space<vmem>>, vector<32x32xbf16>
    %cst = arith.constant dense<0.000000e+00> : vector<8x32xf32>
    %7 = tpu.matmul %5, %6, %cst {dimension_numbers = #tpu.dot_dimension_numbers<[1], [0], [0], [1], [0, 0, 1, 1], [], []>} : vector<8x32xbf16>, vector<32x32xbf16>, vector<8x32xf32> -> vector<8x32xf32>
    %c0_5 = arith.constant 0 : index
    %c0_6 = arith.constant 0 : index
    %8 = vector.load %arg6[%c0_5, %c0_6] : memref<1x32xf32, #tpu.memory_space<vmem>>, vector<1x32xf32>
    %9 = vector.broadcast %8 : vector<1x32xf32> to vector<8x32xf32>
    %10 = arith.addf %7, %9 : vector<8x32xf32>
    %cst_7 = arith.constant 0.353553385 : f32
    %11 = vector.broadcast %cst_7 : f32 to vector<8x32xf32>
    %12 = arith.mulf %10, %11 : vector<8x32xf32>
    %13 = arith.truncf %12 : vector<8x32xf32> to vector<8x32xbf16>
    %c0_8 = arith.constant 0 : index
    %c0_9 = arith.constant 0 : index
    %c0_10 = arith.constant 0 : index
    %14 = vector.load %arg4[%c0_8, %c0_9, %c0_10] : memref<1x1x8xf32, #tpu.memory_space<vmem>>, vector<1x1x8xf32>
    %15 = vector.shape_cast %14 : vector<1x1x8xf32> to vector<1x8xf32>
    %cst_11 = arith.constant 0.000000e+00 : f32
    %16 = vector.broadcast %cst_11 : f32 to vector<1x8xf32>
    %17 = arith.cmpf oeq, %15, %16 : vector<1x8xf32>
    %cst_12 = arith.constant -1.000000e+09 : f32
    %cst_13 = arith.constant 0.000000e+00 : f32
    %18 = vector.broadcast %cst_12 : f32 to vector<1x8xf32>
    %19 = vector.broadcast %cst_13 : f32 to vector<1x8xf32>
    %20 = arith.select %17, %18, %19 : vector<1x8xi1>, vector<1x8xf32>
    %c0_14 = arith.constant 0 : index
    %c0_15 = arith.constant 0 : index
    %21 = vector.load %arg23[%c0_14, %c0_15] : memref<8x32xbf16, #tpu.memory_space<vmem>>, vector<8x32xbf16>
    %c0_16 = arith.constant 0 : index
    %c0_17 = arith.constant 0 : index
    %22 = vector.load %arg24[%c0_16, %c0_17] : memref<8x32xbf16, #tpu.memory_space<vmem>>, vector<8x32xbf16>
    %23 = vector.extract_strided_slice %13 {offsets = [0, 0], sizes = [8, 8], strides = [1, 1]} : vector<8x32xbf16> to vector<8x8xbf16>
    %24 = vector.extract_strided_slice %21 {offsets = [0, 0], sizes = [8, 8], strides = [1, 1]} : vector<8x32xbf16> to vector<8x8xbf16>
    %25 = vector.extract_strided_slice %22 {offsets = [0, 0], sizes = [8, 8], strides = [1, 1]} : vector<8x32xbf16> to vector<8x8xbf16>
    %cst_18 = arith.constant dense<0.000000e+00> : vector<8x8xf32>
    %26 = tpu.matmul %23, %24, %cst_18 {dimension_numbers = #tpu.dot_dimension_numbers<[1], [1], [0], [0], [0, 0, 1, 0], [], []>} : vector<8x8xbf16>, vector<8x8xbf16>, vector<8x8xf32> -> vector<8x8xf32>
    %27 = vector.broadcast %20 : vector<1x8xf32> to vector<8x8xf32>
    %28 = arith.addf %26, %27 : vector<8x8xf32>
    %cst_19 = arith.constant dense<0xFF800000> : vector<8xf32>
    %29 = vector.multi_reduction <maximumf>, %28, %cst_19 [1] : vector<8x8xf32> to vector<8xf32>
    %30 = vector.shape_cast %29 : vector<8xf32> to vector<8x1xf32>
    %31 = vector.broadcast %30 : vector<8x1xf32> to vector<8x8xf32>
    %32 = arith.subf %28, %31 : vector<8x8xf32>
    %33 = math.exp %32 : vector<8x8xf32>
    %cst_20 = arith.constant dense<0.000000e+00> : vector<8xf32>
    %34 = vector.multi_reduction <add>, %33, %cst_20 [1] : vector<8x8xf32> to vector<8xf32>
    %35 = vector.shape_cast %34 : vector<8xf32> to vector<8x1xf32>
    %36 = tpu.reciprocal %35 {approx = true} : vector<8x1xf32> -> vector<8x1xf32>
    %37 = vector.broadcast %36 : vector<8x1xf32> to vector<8x8xf32>
    %38 = arith.mulf %33, %37 : vector<8x8xf32>
    %39 = arith.truncf %38 : vector<8x8xf32> to vector<8x8xbf16>
    %c0_21 = arith.constant 0 : index
    %c0_22 = arith.constant 0 : index
    %c0_23 = arith.constant 0 : index
    %c0_24 = arith.constant 0 : index
    %40 = vector.load %arg22[%c0_21, %c0_22, %c0_23, %c0_24] : memref<1x4x8x8xbf16, #tpu.memory_space<vmem>>, vector<1x1x8x8xbf16>
    %41 = vector.shape_cast %40 : vector<1x1x8x8xbf16> to vector<8x8xbf16>
    %42 = vector.shape_cast %39 : vector<8x8xbf16> to vector<1x1x8x8xbf16>
    tpu.vector_store %arg22[%c0_21, %c0_22, %c0_23, %c0_24], %42 {strides = array<i32>} : memref<1x4x8x8xbf16, #tpu.memory_space<vmem>>, vector<1x1x8x8xbf16>,
    %43 = arith.truncf %38 : vector<8x8xf32> to vector<8x8xbf16>
    %cst_25 = arith.constant dense<0.000000e+00> : vector<8x8xf32>
    %44 = tpu.matmul %43, %25, %cst_25 {dimension_numbers = #tpu.dot_dimension_numbers<[1], [0], [0], [1], [0, 0, 1, 1], [], []>} : vector<8x8xbf16>, vector<8x8xbf16>, vector<8x8xf32> -> vector<8x8xf32>
    %c0_26 = arith.constant 0 : index
    %c0_27 = arith.constant 0 : index
    %45 = vector.load %arg25[%c0_26, %c0_27] : memref<8x32xf32, #tpu.memory_space<vmem>>, vector<8x8xf32>
    tpu.vector_store %arg25[%c0_26, %c0_27], %44 {strides = array<i32>} : memref<8x32xf32, #tpu.memory_space<vmem>>, vector<8x8xf32>,
    %46 = vector.extract_strided_slice %13 {offsets = [0, 8], sizes = [8, 8], strides = [1, 1]} : vector<8x32xbf16> to vector<8x8xbf16>
    %47 = vector.extract_strided_slice %21 {offsets = [0, 8], sizes = [8, 8], strides = [1, 1]} : vector<8x32xbf16> to vector<8x8xbf16>
    %48 = vector.extract_strided_slice %22 {offsets = [0, 8], sizes = [8, 8], strides = [1, 1]} : vector<8x32xbf16> to vector<8x8xbf16>
    %cst_28 = arith.constant dense<0.000000e+00> : vector<8x8xf32>
    %49 = tpu.matmul %46, %47, %cst_28 {dimension_numbers = #tpu.dot_dimension_numbers<[1], [1], [0], [0], [0, 0, 1, 0], [], []>} : vector<8x8xbf16>, vector<8x8xbf16>, vector<8x8xf32> -> vector<8x8xf32>
    %50 = vector.broadcast %20 : vector<1x8xf32> to vector<8x8xf32>
    %51 = arith.addf %49, %50 : vector<8x8xf32>
    %cst_29 = arith.constant dense<0xFF800000> : vector<8xf32>
    %52 = vector.multi_reduction <maximumf>, %51, %cst_29 [1] : vector<8x8xf32> to vector<8xf32>
    %53 = vector.shape_cast %52 : vector<8xf32> to vector<8x1xf32>
    %54 = vector.broadcast %53 : vector<8x1xf32> to vector<8x8xf32>
    %55 = arith.subf %51, %54 : vector<8x8xf32>
    %56 = math.exp %55 : vector<8x8xf32>
    %cst_30 = arith.constant dense<0.000000e+00> : vector<8xf32>
    %57 = vector.multi_reduction <add>, %56, %cst_30 [1] : vector<8x8xf32> to vector<8xf32>
    %58 = vector.shape_cast %57 : vector<8xf32> to vector<8x1xf32>
    %59 = tpu.reciprocal %58 {approx = true} : vector<8x1xf32> -> vector<8x1xf32>
    %60 = vector.broadcast %59 : vector<8x1xf32> to vector<8x8xf32>
    %61 = arith.mulf %56, %60 : vector<8x8xf32>
    %62 = arith.truncf %61 : vector<8x8xf32> to vector<8x8xbf16>
    %c0_31 = arith.constant 0 : index
    %c1 = arith.constant 1 : index
    %c0_32 = arith.constant 0 : index
    %c0_33 = arith.constant 0 : index
    %63 = vector.load %arg22[%c0_31, %c1, %c0_32, %c0_33] : memref<1x4x8x8xbf16, #tpu.memory_space<vmem>>, vector<1x1x8x8xbf16>
    %64 = vector.shape_cast %63 : vector<1x1x8x8xbf16> to vector<8x8xbf16>
    %65 = vector.shape_cast %62 : vector<8x8xbf16> to vector<1x1x8x8xbf16>
    tpu.vector_store %arg22[%c0_31, %c1, %c0_32, %c0_33], %65 {strides = array<i32>} : memref<1x4x8x8xbf16, #tpu.memory_space<vmem>>, vector<1x1x8x8xbf16>,
    %66 = arith.truncf %61 : vector<8x8xf32> to vector<8x8xbf16>
    %cst_34 = arith.constant dense<0.000000e+00> : vector<8x8xf32>
    %67 = tpu.matmul %66, %48, %cst_34 {dimension_numbers = #tpu.dot_dimension_numbers<[1], [0], [0], [1], [0, 0, 1, 1], [], []>} : vector<8x8xbf16>, vector<8x8xbf16>, vector<8x8xf32> -> vector<8x8xf32>
    %c0_35 = arith.constant 0 : index
    %c8 = arith.constant 8 : index
    %68 = vector.load %arg25[%c0_35, %c8] : memref<8x32xf32, #tpu.memory_space<vmem>>, vector<8x8xf32>
    tpu.vector_store %arg25[%c0_35, %c8], %67 {strides = array<i32>} : memref<8x32xf32, #tpu.memory_space<vmem>>, vector<8x8xf32>,
    %69 = vector.extract_strided_slice %13 {offsets = [0, 16], sizes = [8, 8], strides = [1, 1]} : vector<8x32xbf16> to vector<8x8xbf16>
    %70 = vector.extract_strided_slice %21 {offsets = [0, 16], sizes = [8, 8], strides = [1, 1]} : vector<8x32xbf16> to vector<8x8xbf16>
    %71 = vector.extract_strided_slice %22 {offsets = [0, 16], sizes = [8, 8], strides = [1, 1]} : vector<8x32xbf16> to vector<8x8xbf16>
    %cst_36 = arith.constant dense<0.000000e+00> : vector<8x8xf32>
    %72 = tpu.matmul %69, %70, %cst_36 {dimension_numbers = #tpu.dot_dimension_numbers<[1], [1], [0], [0], [0, 0, 1, 0], [], []>} : vector<8x8xbf16>, vector<8x8xbf16>, vector<8x8xf32> -> vector<8x8xf32>
    %73 = vector.broadcast %20 : vector<1x8xf32> to vector<8x8xf32>
    %74 = arith.addf %72, %73 : vector<8x8xf32>
    %cst_37 = arith.constant dense<0xFF800000> : vector<8xf32>
    %75 = vector.multi_reduction <maximumf>, %74, %cst_37 [1] : vector<8x8xf32> to vector<8xf32>
    %76 = vector.shape_cast %75 : vector<8xf32> to vector<8x1xf32>
    %77 = vector.broadcast %76 : vector<8x1xf32> to vector<8x8xf32>
    %78 = arith.subf %74, %77 : vector<8x8xf32>
    %79 = math.exp %78 : vector<8x8xf32>
    %cst_38 = arith.constant dense<0.000000e+00> : vector<8xf32>
    %80 = vector.multi_reduction <add>, %79, %cst_38 [1] : vector<8x8xf32> to vector<8xf32>
    %81 = vector.shape_cast %80 : vector<8xf32> to vector<8x1xf32>
    %82 = tpu.reciprocal %81 {approx = true} : vector<8x1xf32> -> vector<8x1xf32>
    %83 = vector.broadcast %82 : vector<8x1xf32> to vector<8x8xf32>
    %84 = arith.mulf %79, %83 : vector<8x8xf32>
    %85 = arith.truncf %84 : vector<8x8xf32> to vector<8x8xbf16>
    %c0_39 = arith.constant 0 : index
    %c2 = arith.constant 2 : index
    %c0_40 = arith.constant 0 : index
    %c0_41 = arith.constant 0 : index
    %86 = vector.load %arg22[%c0_39, %c2, %c0_40, %c0_41] : memref<1x4x8x8xbf16, #tpu.memory_space<vmem>>, vector<1x1x8x8xbf16>
    %87 = vector.shape_cast %86 : vector<1x1x8x8xbf16> to vector<8x8xbf16>
    %88 = vector.shape_cast %85 : vector<8x8xbf16> to vector<1x1x8x8xbf16>
    tpu.vector_store %arg22[%c0_39, %c2, %c0_40, %c0_41], %88 {strides = array<i32>} : memref<1x4x8x8xbf16, #tpu.memory_space<vmem>>, vector<1x1x8x8xbf16>,
    %89 = arith.truncf %84 : vector<8x8xf32> to vector<8x8xbf16>
    %cst_42 = arith.constant dense<0.000000e+00> : vector<8x8xf32>
    %90 = tpu.matmul %89, %71, %cst_42 {dimension_numbers = #tpu.dot_dimension_numbers<[1], [0], [0], [1], [0, 0, 1, 1], [], []>} : vector<8x8xbf16>, vector<8x8xbf16>, vector<8x8xf32> -> vector<8x8xf32>
    %c0_43 = arith.constant 0 : index
    %c16 = arith.constant 16 : index
    %91 = vector.load %arg25[%c0_43, %c16] : memref<8x32xf32, #tpu.memory_space<vmem>>, vector<8x8xf32>
    tpu.vector_store %arg25[%c0_43, %c16], %90 {strides = array<i32>} : memref<8x32xf32, #tpu.memory_space<vmem>>, vector<8x8xf32>,
    %92 = vector.extract_strided_slice %13 {offsets = [0, 24], sizes = [8, 8], strides = [1, 1]} : vector<8x32xbf16> to vector<8x8xbf16>
    %93 = vector.extract_strided_slice %21 {offsets = [0, 24], sizes = [8, 8], strides = [1, 1]} : vector<8x32xbf16> to vector<8x8xbf16>
    %94 = vector.extract_strided_slice %22 {offsets = [0, 24], sizes = [8, 8], strides = [1, 1]} : vector<8x32xbf16> to vector<8x8xbf16>
    %cst_44 = arith.constant dense<0.000000e+00> : vector<8x8xf32>
    %95 = tpu.matmul %92, %93, %cst_44 {dimension_numbers = #tpu.dot_dimension_numbers<[1], [1], [0], [0], [0, 0, 1, 0], [], []>} : vector<8x8xbf16>, vector<8x8xbf16>, vector<8x8xf32> -> vector<8x8xf32>
    %96 = vector.broadcast %20 : vector<1x8xf32> to vector<8x8xf32>
    %97 = arith.addf %95, %96 : vector<8x8xf32>
    %cst_45 = arith.constant dense<0xFF800000> : vector<8xf32>
    %98 = vector.multi_reduction <maximumf>, %97, %cst_45 [1] : vector<8x8xf32> to vector<8xf32>
    %99 = vector.shape_cast %98 : vector<8xf32> to vector<8x1xf32>
    %100 = vector.broadcast %99 : vector<8x1xf32> to vector<8x8xf32>
    %101 = arith.subf %97, %100 : vector<8x8xf32>
    %102 = math.exp %101 : vector<8x8xf32>
    %cst_46 = arith.constant dense<0.000000e+00> : vector<8xf32>
    %103 = vector.multi_reduction <add>, %102, %cst_46 [1] : vector<8x8xf32> to vector<8xf32>
    %104 = vector.shape_cast %103 : vector<8xf32> to vector<8x1xf32>
    %105 = tpu.reciprocal %104 {approx = true} : vector<8x1xf32> -> vector<8x1xf32>
    %106 = vector.broadcast %105 : vector<8x1xf32> to vector<8x8xf32>
    %107 = arith.mulf %102, %106 : vector<8x8xf32>
    %108 = arith.truncf %107 : vector<8x8xf32> to vector<8x8xbf16>
    %c0_47 = arith.constant 0 : index
    %c3 = arith.constant 3 : index
    %c0_48 = arith.constant 0 : index
    %c0_49 = arith.constant 0 : index
    %109 = vector.load %arg22[%c0_47, %c3, %c0_48, %c0_49] : memref<1x4x8x8xbf16, #tpu.memory_space<vmem>>, vector<1x1x8x8xbf16>
    %110 = vector.shape_cast %109 : vector<1x1x8x8xbf16> to vector<8x8xbf16>
    %111 = vector.shape_cast %108 : vector<8x8xbf16> to vector<1x1x8x8xbf16>
    tpu.vector_store %arg22[%c0_47, %c3, %c0_48, %c0_49], %111 {strides = array<i32>} : memref<1x4x8x8xbf16, #tpu.memory_space<vmem>>, vector<1x1x8x8xbf16>,
    %112 = arith.truncf %107 : vector<8x8xf32> to vector<8x8xbf16>
    %cst_50 = arith.constant dense<0.000000e+00> : vector<8x8xf32>
    %113 = tpu.matmul %112, %94, %cst_50 {dimension_numbers = #tpu.dot_dimension_numbers<[1], [0], [0], [1], [0, 0, 1, 1], [], []>} : vector<8x8xbf16>, vector<8x8xbf16>, vector<8x8xf32> -> vector<8x8xf32>
    %c0_51 = arith.constant 0 : index
    %c24 = arith.constant 24 : index
    %114 = vector.load %arg25[%c0_51, %c24] : memref<8x32xf32, #tpu.memory_space<vmem>>, vector<8x8xf32>
    tpu.vector_store %arg25[%c0_51, %c24], %113 {strides = array<i32>} : memref<8x32xf32, #tpu.memory_space<vmem>>, vector<8x8xf32>,
    %c0_52 = arith.constant 0 : index
    %c0_53 = arith.constant 0 : index
    %115 = vector.load %arg25[%c0_52, %c0_53] : memref<8x32xf32, #tpu.memory_space<vmem>>, vector<8x32xf32>
    %116 = arith.truncf %115 : vector<8x32xf32> to vector<8x32xbf16>
    %c0_54 = arith.constant 0 : index
    %c0_55 = arith.constant 0 : index
    %117 = vector.load %arg11[%c0_54, %c0_55] : memref<32x32xbf16, #tpu.memory_space<vmem>>, vector<32x32xbf16>
    %cst_56 = arith.constant dense<0.000000e+00> : vector<8x32xf32>
    %118 = tpu.matmul %116, %117, %cst_56 {dimension_numbers = #tpu.dot_dimension_numbers<[1], [0], [0], [1], [0, 0, 1, 1], [], []>} : vector<8x32xbf16>, vector<32x32xbf16>, vector<8x32xf32> -> vector<8x32xf32>
    %c0_57 = arith.constant 0 : index
    %c0_58 = arith.constant 0 : index
    %119 = vector.load %arg12[%c0_57, %c0_58] : memref<1x32xf32, #tpu.memory_space<vmem>>, vector<1x32xf32>
    %120 = vector.broadcast %119 : vector<1x32xf32> to vector<8x32xf32>
    %121 = arith.addf %118, %120 : vector<8x32xf32>
    %122 = arith.addf %4, %121 : vector<8x32xf32>
    %c0_59 = arith.constant 0 : index
    %c0_60 = arith.constant 0 : index
    %123 = vector.load %arg17[%c0_59, %c0_60] : memref<1x32xf32, #tpu.memory_space<vmem>>, vector<1x32xf32>
    %c0_61 = arith.constant 0 : index
    %c0_62 = arith.constant 0 : index
    %124 = vector.load %arg18[%c0_61, %c0_62] : memref<1x32xf32, #tpu.memory_space<vmem>>, vector<1x32xf32>
    %cst_63 = arith.constant dense<0.000000e+00> : vector<8xf32>
    %125 = vector.multi_reduction <add>, %122, %cst_63 [1] : vector<8x32xf32> to vector<8xf32>
    %126 = vector.shape_cast %125 : vector<8xf32> to vector<8x1xf32>
    %cst_64 = arith.constant 3.200000e+01 : f32
    %127 = vector.broadcast %cst_64 : f32 to vector<8x1xf32>
    %128 = arith.divf %126, %127 : vector<8x1xf32>
    %129 = vector.broadcast %128 : vector<8x1xf32> to vector<8x32xf32>
    %130 = arith.subf %122, %129 : vector<8x32xf32>
    %131 = arith.mulf %130, %130 : vector<8x32xf32>
    %cst_65 = arith.constant dense<0.000000e+00> : vector<8xf32>
    %132 = vector.multi_reduction <add>, %131, %cst_65 [1] : vector<8x32xf32> to vector<8xf32>
    %133 = vector.shape_cast %132 : vector<8xf32> to vector<8x1xf32>
    %cst_66 = arith.constant 3.200000e+01 : f32
    %134 = vector.broadcast %cst_66 : f32 to vector<8x1xf32>
    %135 = arith.divf %133, %134 : vector<8x1xf32>
    %136 = vector.broadcast %128 : vector<8x1xf32> to vector<8x32xf32>
    %137 = arith.subf %122, %136 : vector<8x32xf32>
    %cst_67 = arith.constant 9.99999974E-6 : f32
    %138 = vector.broadcast %cst_67 : f32 to vector<8x1xf32>
    %139 = arith.addf %135, %138 : vector<8x1xf32>
    %140 = math.rsqrt %139 : vector<8x1xf32>
    %141 = vector.broadcast %140 : vector<8x1xf32> to vector<8x32xf32>
    %142 = arith.mulf %137, %141 : vector<8x32xf32>
    %143 = vector.broadcast %123 : vector<1x32xf32> to vector<8x32xf32>
    %144 = arith.mulf %142, %143 : vector<8x32xf32>
    %145 = vector.broadcast %124 : vector<1x32xf32> to vector<8x32xf32>
    %146 = arith.addf %144, %145 : vector<8x32xf32>
    %147 = arith.truncf %146 : vector<8x32xf32> to vector<8x32xbf16>
    %c0_68 = arith.constant 0 : index
    %c0_69 = arith.constant 0 : index
    %148 = vector.load %arg13[%c0_68, %c0_69] : memref<32x128xbf16, #tpu.memory_space<vmem>>, vector<32x128xbf16>
    %cst_70 = arith.constant dense<0.000000e+00> : vector<8x128xf32>
    %149 = tpu.matmul %147, %148, %cst_70 {dimension_numbers = #tpu.dot_dimension_numbers<[1], [0], [0], [1], [0, 0, 1, 1], [], []>} : vector<8x32xbf16>, vector<32x128xbf16>, vector<8x128xf32> -> vector<8x128xf32>
    %c0_71 = arith.constant 0 : index
    %c0_72 = arith.constant 0 : index
    %150 = vector.load %arg14[%c0_71, %c0_72] : memref<1x128xf32, #tpu.memory_space<vmem>>, vector<1x128xf32>
    %151 = vector.broadcast %150 : vector<1x128xf32> to vector<8x128xf32>
    %152 = arith.addf %149, %151 : vector<8x128xf32>
    %cst_73 = arith.constant 0.000000e+00 : f32
    %153 = vector.broadcast %cst_73 : f32 to vector<8x128xf32>
    %154 = arith.maximumf %152, %153 : vector<8x128xf32>
    %155 = arith.truncf %154 : vector<8x128xf32> to vector<8x128xbf16>
    %c0_74 = arith.constant 0 : index
    %c0_75 = arith.constant 0 : index
    %156 = vector.load %arg15[%c0_74, %c0_75] : memref<128x32xbf16, #tpu.memory_space<vmem>>, vector<128x32xbf16>
    %cst_76 = arith.constant dense<0.000000e+00> : vector<8x32xf32>
    %157 = tpu.matmul %155, %156, %cst_76 {dimension_numbers = #tpu.dot_dimension_numbers<[1], [0], [0], [1], [0, 0, 1, 1], [], []>} : vector<8x128xbf16>, vector<128x32xbf16>, vector<8x32xf32> -> vector<8x32xf32>
    %c0_77 = arith.constant 0 : index
    %c0_78 = arith.constant 0 : index
    %158 = vector.load %arg16[%c0_77, %c0_78] : memref<1x32xf32, #tpu.memory_space<vmem>>, vector<1x32xf32>
    %159 = vector.broadcast %158 : vector<1x32xf32> to vector<8x32xf32>
    %160 = arith.addf %157, %159 : vector<8x32xf32>
    %161 = arith.addf %146, %160 : vector<8x32xf32>
    %c0_79 = arith.constant 0 : index
    %c0_80 = arith.constant 0 : index
    %162 = vector.load %arg19[%c0_79, %c0_80] : memref<1x32xf32, #tpu.memory_space<vmem>>, vector<1x32xf32>
    %c0_81 = arith.constant 0 : index
    %c0_82 = arith.constant 0 : index
    %163 = vector.load %arg20[%c0_81, %c0_82] : memref<1x32xf32, #tpu.memory_space<vmem>>, vector<1x32xf32>
    %cst_83 = arith.constant dense<0.000000e+00> : vector<8xf32>
    %164 = vector.multi_reduction <add>, %161, %cst_83 [1] : vector<8x32xf32> to vector<8xf32>
    %165 = vector.shape_cast %164 : vector<8xf32> to vector<8x1xf32>
    %cst_84 = arith.constant 3.200000e+01 : f32
    %166 = vector.broadcast %cst_84 : f32 to vector<8x1xf32>
    %167 = arith.divf %165, %166 : vector<8x1xf32>
    %168 = vector.broadcast %167 : vector<8x1xf32> to vector<8x32xf32>
    %169 = arith.subf %161, %168 : vector<8x32xf32>
    %170 = arith.mulf %169, %169 : vector<8x32xf32>
    %cst_85 = arith.constant dense<0.000000e+00> : vector<8xf32>
    %171 = vector.multi_reduction <add>, %170, %cst_85 [1] : vector<8x32xf32> to vector<8xf32>
    %172 = vector.shape_cast %171 : vector<8xf32> to vector<8x1xf32>
    %cst_86 = arith.constant 3.200000e+01 : f32
    %173 = vector.broadcast %cst_86 : f32 to vector<8x1xf32>
    %174 = arith.divf %172, %173 : vector<8x1xf32>
    %175 = vector.broadcast %167 : vector<8x1xf32> to vector<8x32xf32>
    %176 = arith.subf %161, %175 : vector<8x32xf32>
    %cst_87 = arith.constant 9.99999974E-6 : f32
    %177 = vector.broadcast %cst_87 : f32 to vector<8x1xf32>
    %178 = arith.addf %174, %177 : vector<8x1xf32>
    %179 = math.rsqrt %178 : vector<8x1xf32>
    %180 = vector.broadcast %179 : vector<8x1xf32> to vector<8x32xf32>
    %181 = arith.mulf %176, %180 : vector<8x32xf32>
    %182 = vector.broadcast %162 : vector<1x32xf32> to vector<8x32xf32>
    %183 = arith.mulf %181, %182 : vector<8x32xf32>
    %184 = vector.broadcast %163 : vector<1x32xf32> to vector<8x32xf32>
    %185 = arith.addf %183, %184 : vector<8x32xf32>
    %c0_88 = arith.constant 0 : index
    %c0_89 = arith.constant 0 : index
    %c0_90 = arith.constant 0 : index
    %186 = vector.load %arg21[%c0_88, %c0_89, %c0_90] : memref<1x8x32xf32, #tpu.memory_space<vmem>>, vector<1x8x32xf32>
    %187 = vector.shape_cast %186 : vector<1x8x32xf32> to vector<8x32xf32>
    %188 = vector.shape_cast %185 : vector<8x32xf32> to vector<1x8x32xf32>
    tpu.vector_store %arg21[%c0_88, %c0_89, %c0_90], %188 {strides = array<i32>} : memref<1x8x32xf32, #tpu.memory_space<vmem>>, vector<1x8x32xf32>,
    return
  }
  func.func @transform_0(%arg0: i32, %arg1: i32) -> (i32, i32, i32) {
    %c0_i32 = arith.constant 0 : i32
    %c0_i32_0 = arith.constant 0 : i32
    return %arg0, %arg1, %c0_i32 : i32, i32, i32
  }
  func.func @transform_1(%arg0: i32, %arg1: i32) -> (i32, i32, i32) {
    %c0_i32 = arith.constant 0 : i32
    %c0_i32_0 = arith.constant 0 : i32
    %c0_i32_1 = arith.constant 0 : i32
    return %arg0, %c0_i32, %c0_i32_0 : i32, i32, i32
  }
  func.func @transform_2(%arg0: i32, %arg1: i32) -> (i32, i32, i32) {
    %c0_i32 = arith.constant 0 : i32
    %c0_i32_0 = arith.constant 0 : i32
    %c0_i32_1 = arith.constant 0 : i32
    return %arg0, %c0_i32, %c0_i32_0 : i32, i32, i32
  }
  func.func @transform_3(%arg0: i32, %arg1: i32) -> (i32, i32) {
    %c0_i32 = arith.constant 0 : i32
    %c0_i32_0 = arith.constant 0 : i32
    %c0_i32_1 = arith.constant 0 : i32
    return %c0_i32, %c0_i32_0 : i32, i32
  }
  func.func @transform_4(%arg0: i32, %arg1: i32) -> (i32, i32) {
    %c0_i32 = arith.constant 0 : i32
    %c0_i32_0 = arith.constant 0 : i32
    %c0_i32_1 = arith.constant 0 : i32
    return %c0_i32, %c0_i32_0 : i32, i32
  }
  func.func @transform_5(%arg0: i32, %arg1: i32) -> (i32, i32) {
    %c0_i32 = arith.constant 0 : i32
    %c0_i32_0 = arith.constant 0 : i32
    %c0_i32_1 = arith.constant 0 : i32
    return %c0_i32, %c0_i32_0 : i32, i32
  }
  func.func @transform_6(%arg0: i32, %arg1: i32) -> (i32, i32) {
    %c0_i32 = arith.constant 0 : i32
    %c0_i32_0 = arith.constant 0 : i32
    %c0_i32_1 = arith.constant 0 : i32
    return %c0_i32, %c0_i32_0 : i32, i32
  }
  func.func @transform_7(%arg0: i32, %arg1: i32) -> (i32, i32) {
    %c0_i32 = arith.constant 0 : i32
    %c0_i32_0 = arith.constant 0 : i32
    %c0_i32_1 = arith.constant 0 : i32
    return %c0_i32, %c0_i32_0 : i32, i32
  }
  func.func @transform_8(%arg0: i32, %arg1: i32) -> (i32, i32) {
    %c0_i32 = arith.constant 0 : i32
    %c0_i32_0 = arith.constant 0 : i32
    %c0_i32_1 = arith.constant 0 : i32
    return %c0_i32, %c0_i32_0 : i32, i32
  }
  func.func @transform_9(%arg0: i32, %arg1: i32) -> (i32, i32) {
    %c0_i32 = arith.constant 0 : i32
    %c0_i32_0 = arith.constant 0 : i32
    %c0_i32_1 = arith.constant 0 : i32
    return %c0_i32, %c0_i32_0 : i32, i32
  }
  func.func @transform_10(%arg0: i32, %arg1: i32) -> (i32, i32) {
    %c0_i32 = arith.constant 0 : i32
    %c0_i32_0 = arith.constant 0 : i32
    %c0_i32_1 = arith.constant 0 : i32
    return %c0_i32, %c0_i32_0 : i32, i32
  }
  func.func @transform_11(%arg0: i32, %arg1: i32) -> (i32, i32) {
    %c0_i32 = arith.constant 0 : i32
    %c0_i32_0 = arith.constant 0 : i32
    %c0_i32_1 = arith.constant 0 : i32
    return %c0_i32, %c0_i32_0 : i32, i32
  }
  func.func @transform_12(%arg0: i32, %arg1: i32) -> (i32, i32) {
    %c0_i32 = arith.constant 0 : i32
    %c0_i32_0 = arith.constant 0 : i32
    %c0_i32_1 = arith.constant 0 : i32
    return %c0_i32, %c0_i32_0 : i32, i32
  }
  func.func @transform_13(%arg0: i32, %arg1: i32) -> (i32, i32) {
    %c0_i32 = arith.constant 0 : i32
    %c0_i32_0 = arith.constant 0 : i32
    %c0_i32_1 = arith.constant 0 : i32
    return %c0_i32, %c0_i32_0 : i32, i32
  }
  func.func @transform_14(%arg0: i32, %arg1: i32) -> (i32, i32) {
    %c0_i32 = arith.constant 0 : i32
    %c0_i32_0 = arith.constant 0 : i32
    %c0_i32_1 = arith.constant 0 : i32
    return %c0_i32, %c0_i32_0 : i32, i32
  }
  func.func @transform_15(%arg0: i32, %arg1: i32) -> (i32, i32) {
    %c0_i32 = arith.constant 0 : i32
    %c0_i32_0 = arith.constant 0 : i32
    %c0_i32_1 = arith.constant 0 : i32
    return %c0_i32, %c0_i32_0 : i32, i32
  }
  func.func @transform_16(%arg0: i32, %arg1: i32) -> (i32, i32) {
    %c0_i32 = arith.constant 0 : i32
    %c0_i32_0 = arith.constant 0 : i32
    %c0_i32_1 = arith.constant 0 : i32
    return %c0_i32, %c0_i32_0 : i32, i32
  }
  func.func @transform_17(%arg0: i32, %arg1: i32) -> (i32, i32) {
    %c0_i32 = arith.constant 0 : i32
    %c0_i32_0 = arith.constant 0 : i32
    %c0_i32_1 = arith.constant 0 : i32
    return %c0_i32, %c0_i32_0 : i32, i32
  }
  func.func @transform_18(%arg0: i32, %arg1: i32) -> (i32, i32) {
    %c0_i32 = arith.constant 0 : i32
    %c0_i32_0 = arith.constant 0 : i32
    %c0_i32_1 = arith.constant 0 : i32
    return %c0_i32, %c0_i32_0 : i32, i32
  }
  func.func @transform_19(%arg0: i32, %arg1: i32) -> (i32, i32, i32) {
    %c0_i32 = arith.constant 0 : i32
    %c0_i32_0 = arith.constant 0 : i32
    return %arg0, %arg1, %c0_i32 : i32, i32, i32
  }
  func.func @transform_20(%arg0: i32, %arg1: i32) -> (i32, i32, i32, i32) {
    %c0_i32 = arith.constant 0 : i32
    %c0_i32_0 = arith.constant 0 : i32
    %c0_i32_1 = arith.constant 0 : i32
    return %arg0, %c0_i32, %arg1, %c0_i32_0 : i32, i32, i32, i32
  }
}

</mosaic_0001>

<bundles_post_ra>
// kernel: tpu_custom_call.1
= control target key start
LH: loop header
LB: loop body
LE: loop exit
PB: predicated region body
PF: predicated region fallthrough
CT: control target
= control target key end

     0   :  { %s3150_s0 = inlined_call_operand.vmem [shape: f32[2,8,32], index: 0, kind: input, shape index: {}]   ;;  %s3151_s1 = inlined_call_operand.vmem [shape: f32[2,8,32], index: 1, kind: input, shape index: {}]   ;;  %s3152_s2 = inlined_call_operand.vmem [shape: f32[2,1,8], index: 2, kind: input, shape index: {}]   ;;  %s3153_s3 = inlined_call_operand.vmem [shape: bf16[32,32], index: 3, kind: input, shape index: {}]   ;;  %s3154_s4 = inlined_call_operand.hbm [shape: f32[1,32], index: 4, kind: input, shape index: {}]   ;;  %s3155_s5 = inlined_call_operand.vmem [shape: bf16[32,32], index: 5, kind: input, shape index: {}]   ;;  %s3156_s6 = inlined_call_operand.hbm [shape: f32[1,32], index: 6, kind: input, shape index: {}]   ;;  %s3157_s7 = inlined_call_operand.vmem [shape: bf16[32,32], index: 7, kind: input, shape index: {}]   ;;  %s3158_s8 = inlined_call_operand.hbm [shape: f32[1,32], index: 8, kind: input, shape index: {}]   ;;  %s3159_s9 = inlined_call_operand.vmem [shape: bf16[32,32], index: 9, kind: input, shape index: {}]   ;;  %s3160_s10 = inlined_call_operand.vmem [shape: f32[1,32], index: 10, kind: input, shape index: {}]   ;;  %s3161_s11 = inlined_call_operand.hbm [shape: bf16[32,128], index: 11, kind: input, shape index: {}]   ;;  %s3162_s12 = inlined_call_operand.vmem [shape: f32[1,128], index: 12, kind: input, shape index: {}]   ;;  %s3163_s13 = inlined_call_operand.vmem [shape: bf16[128,32], index: 13, kind: input, shape index: {}]   ;;  %s3164_s14 = inlined_call_operand.vmem [shape: f32[1,32], index: 14, kind: input, shape index: {}]   ;;  %s3165_s15 = inlined_call_operand.vmem [shape: f32[1,32], index: 15, kind: input, shape index: {}]   ;;  %s3166_s16 = inlined_call_operand.vmem [shape: f32[1,32], index: 16, kind: input, shape index: {}]   ;;  %s3167_s17 = inlined_call_operand.vmem [shape: f32[1,32], index: 17, kind: input, shape index: {}]   ;;  %s3168_s18 = inlined_call_operand.vmem [shape: f32[1,32], index: 18, kind: input, shape index: {}]   ;;  %s3169_s19 = inlined_call_operand.hbm [shape: f32[2,8,32], index: 19, kind: output, shape index: {0}]   ;;  %s3170_s20 = inlined_call_operand.hbm [shape: bf16[2,4,8,8], index: 20, kind: output, shape index: {1}]  }
   0x1   :  { %3188 = sst [smem:[#allocation29_spill]] %s3150_s0 }
   0x2   :  { %3189 = sst [smem:[#allocation30_spill]] %s3151_s1 }
   0x3   :  { %3190 = sst [smem:[#allocation31_spill]] %s3152_s2 }
   0x4   :  { %3191 = sst [smem:[#allocation32_spill]] %s3153_s3 }
   0x5   :  { %3192 = sst [smem:[#allocation33_spill]] %s3154_s4 }
   0x6   :  { %3193 = sst [smem:[#allocation34_spill]] %s3155_s5 }
   0x7   :  { %3194 = sst [smem:[#allocation35_spill]] %s3156_s6 }
   0x8   :  { %3195 = sst [smem:[#allocation36_spill]] %s3167_s17 }
   0x9   :  { %3196 = sst [smem:[#allocation37_spill]] %s3168_s18 }
   0xa   :  { %3197 = sst [smem:[#allocation38_spill]] %s3169_s19 }
   0xb   :  { %3198 = sst [smem:[#allocation39_spill]] %s3170_s20 }
   0xc   :  { %26 = vsyncpa [#allocation6], 0 }
   0xd   :  { %27 = vsyncpa [#allocation9], 0 }
   0xe   :  { %28 = vsyncpa [#allocation12], 0 }
   0xf   :  { %29 = vsyncpa [#allocation7], 0 }
  0x10   :  { %31 = vsyncpa [#allocation7 + $0x1], 0 }
  0x11   :  { %32 = vsyncpa [#allocation15], 0 }
  0x12   :  { %34 = vsyncpa [#allocation15 + $0x1], 0  ;;  %s2686_s1 = smov 0   ;;  %s2688_s22 = smov 0  }
  0x13   :  { %s2690_s23 = smov 0   ;;  %s2692_s24 = smov 0  }
  0x14   :  { %s2694_s2 = smov 0   ;;  %s2696_s25 = smov 0  }
  0x15 LB: > { %3199 = sst [smem:[#allocation21_spill]] %s2541_s1  ;;  %s1955_s3 = sadd.s32 4294967295, %s2561_s25   ;;  %s2561_s25 = sphi %s2696_s25, %s40_s25   ;;  %s2557_s2 = sphi %s2694_s2, %s3235_s2   ;;  %s2553_s24 = sphi %s2692_s24, %s3234_s24   ;;  %s2549_s23 = sphi %s2690_s23, %s3233_s23   ;;  %s2545_s22 = sphi %s2688_s22, %s3237_s22   ;;  %s2541_s1 = sphi %s2686_s1, %s3236_s1  }
  0x16   : > { %3200 = sst [smem:[#allocation22_spill]] %s2549_s23  ;;  %s1956_s26 = sadd.s32 4294967294, %s2561_s25  }
  0x17   : > { %3201 = sst [smem:[#allocation23_spill]] %s2557_s2  ;;  %s52_s27 = sadd.s32 1, %s2557_s2 }
  0x18   : > { %3202 = sst [smem:[#allocation24_spill]] %s2561_s25  ;;  %s477_s28 = sadd.s32 1, %s2549_s23 }
  0x19   : > { %p54_p0 = scmp.ge.s32.totalorder %s52_s27, 2  ;;  %p487_p1 = scmp.ne.s32.totalorder %s2549_s23, %s2545_s22 }
  0x1a   : > { %p488_p2 = scmp.eq.s32.totalorder %s1955_s3, 1  ;;  %p493_p3 = scmp.ne.s32.totalorder %s2545_s22, %s2541_s1 }
  0x1b   : > { %s3239_s27 = smov (%p54_p0, %s52_s27), 0  ;;  %p494_p5 = scmp.eq.s32.totalorder %s1956_s26, 1 }
  0x1c   : > { %3203 = sst [smem:[#allocation25_spill]] %s3239_s27  ;;  %p2726_p4 = por %p488_p2, %p487_p1 }
  0x1d   : > { %s472_s29 = ssub.s32 %s2557_s2, %s3239_s27  ;;  %p1957_p6 = scmp.ge.s32.totalorder %s2561_s25, 1 }
  0x1e   : > { %s3204_s4 = scalar_select %p2726_p4, 1, 0 }
  0x1f   : > { %p475_p7 = scmp.eq.s32.totalorder %s472_s29, 0  ;;  %p2733_p8 = por %p494_p5, %p493_p3 }
  0x20   : > { %3205 = sst [smem:[#allocation26_spill]] %s3204_s4  ;;  %p529_p9 = scmp.lt.s32.totalorder %s2561_s25, 3 }
  0x21   : > { %s3206_s30 = scalar_select %p2733_p8, 1, 0 }
  0x22   : > { %s2739_s0 = scalar_select %p475_p7, %s2549_s23, %s477_s28  }
  0x23   : > { %3207 = sst [smem:[#allocation27_spill]] %s3206_s30  ;;  %p2741_p10 = pnand %p1957_p6, %p529_p9 }
  0x24   : > { %3208 = sst [smem:[#allocation28_spill]] %s2739_s0  ;;  %p2745_p11 = scmp.eq.s32.totalorder %s1955_s3, 0 }
  0x25   : > { %s3209_s21 = scalar_select %p2741_p10, 1, 0 }
  0x26   : > { %s3210_s1 = scalar_select %p2745_p11, 1, 0 }
  0x27   : > { %p2194_p12 = pneg %p2741_p10  ;;  %s2563_s26 = smov [#allocation8]  }
  0x28   : > { %s559_s29 = sshll.u32 %s2563_s26, 4  ;;  %s2564_s28 = smov [#allocation5]   ;;  %s560_s29 = int_to_ptr.vmem [resolvable:$true] %s559_s29 }
  0x29   : > { %p2753_p13 = pnand %p2745_p11, %p2194_p12  ;;  %s545_s2 = sshll.u32 %s2564_s28, 4  ;;  %s2757_s2 = int_to_ptr.vmem [resolvable:$true] %s545_s2 }
  0x2a   : > { %s3212_s6 = sld [smem:[#allocation35_spill]] }
  0x2b   : > { %p2767_p1 = pneg %p2753_p13 }
  0x30   : > { %s2327_s23 = scalar_lea.hbm %s3212_s6, 16 }
  0x31   : > { %p2328_p0 = scmp.ne.s32.totalorder %s3212_s6, %s2327_s23  ;;  %p2334_p5 = scmp.lt.u32.totalorder %s2327_s23, %s3212_s6 }
  0x33   : > { %p2330_p2 = pnand %p2767_p1, %p2328_p0 }
  0x35   : > { %p2331_p3 = pneg %p2330_p2 }
  0x37   : > { %p2336_p6 = pnand %p2334_p5, %p2331_p3 }
  0x39   : > { %2339 = shalt.err (!%p2336_p6)
}
  0x3a   : > { %s2340_s0 = scalar_lea.vmem %s560_s29, 16  ;;  %s2347_s25 = scalar_lea.vmem %s560_s29, 32 }
  0x3b   : > { %p2341_p7 = scmp.ne.s32.totalorder %s560_s29, %s2340_s0  ;;  %p2348_p8 = scmp.lt.s32.totalorder %s560_s29, %s560_s29 }
  0x3c   : > { %p2349_p4 = scmp.lt.s32.totalorder %s2347_s25, %s2340_s0 }
  0x3d   : > { %p2343_p9 = pnand %p2341_p7, %p2767_p1 }
  0x3e   : > { %p2350_p11 = por %p2349_p4, %p2348_p8 }
  0x3f   : > { %p2344_p12 = pneg %p2343_p9 }
  0x41   : > { %p2351_p10 = pnand %p2350_p11, %p2344_p12 }
  0x43   : > { %2354 = shalt.err (!%p2351_p10)
}
  0x44   : > { %2200 = dma.hbm_to_vmem [thread:$0]  (!%p2753_p13), %s3212_s6, 16, %s560_s29, [#allocation9]  }
  0x45   : > { %s3214_s28 = sld [smem:[#allocation33_spill]] }
  0x4b   : > { %s2355_s18 = scalar_lea.hbm %s3214_s28, 16 }
  0x4c   : > { %p2356_p0 = scmp.ne.s32.totalorder %s3214_s28, %s2355_s18  ;;  %p2362_p8 = scmp.lt.u32.totalorder %s2355_s18, %s3214_s28 }
  0x4e   : > { %p2358_p2 = pnand %p2356_p0, %p2767_p1 }
  0x50   : > { %p2359_p4 = pneg %p2358_p2 }
  0x52   : > { %p2364_p10 = pnand %p2362_p8, %p2359_p4 }
  0x54   : > { %2367 = shalt.err (!%p2364_p10)
}
  0x55   : > { %s2368_s29 = scalar_lea.vmem %s2757_s2, 16  ;;  %s2375_s17 = scalar_lea.vmem %s2757_s2, 32 }
  0x56   : > { %p2369_p11 = scmp.ne.s32.totalorder %s2757_s2, %s2368_s29  ;;  %p2376_p6 = scmp.lt.s32.totalorder %s2757_s2, %s2757_s2 }
  0x57   : > { %p2377_p7 = scmp.lt.s32.totalorder %s2375_s17, %s2368_s29 }
  0x58   : > { %p2371_p3 = pnand %p2369_p11, %p2767_p1 }
  0x59   : > { %p2378_p9 = por %p2377_p7, %p2376_p6 }
  0x5a   : > { %p2372_p5 = pneg %p2371_p3 }
  0x5c   : > { %p2379_p12 = pnand %p2378_p9, %p2372_p5 }
  0x5e   : > { %2382 = shalt.err (!%p2379_p12)
}
  0x5f   : > { %2197 = dma.hbm_to_vmem [thread:$0]  (!%p2753_p13), %s3214_s28, 16, %s2757_s2, [#allocation6]  }
  0x60   : > { %s2565_s30 = smov [#allocation10]   ;;  %s2566_s19 = smov [#allocation11]  }
  0x61   : > { %s573_s3 = sshll.u32 %s2565_s30, 4  ;;  %s589_s23 = sshll.u32 %s2566_s19, 4  ;;  %s574_s3 = int_to_ptr.vmem [resolvable:$true] %s573_s3  ;;  %s590_s23 = int_to_ptr.vmem [resolvable:$true] %s589_s23 }
  0x62   : > { %s2383_s29 = scalar_lea.hbm %s3158_s8, 16 }
  0x63   : > { %p2384_p0 = scmp.ne.s32.totalorder %s3158_s8, %s2383_s29  ;;  %p2390_p8 = scmp.lt.u32.totalorder %s2383_s29, %s3158_s8 }
  0x65   : > { %p2386_p2 = pnand %p2384_p0, %p2767_p1 }
  0x67   : > { %p2387_p4 = pneg %p2386_p2 }
  0x69   : > { %p2392_p10 = pnand %p2390_p8, %p2387_p4 }
  0x6b   : > { %2395 = shalt.err (!%p2392_p10)
}
  0x6c   : > { %s2396_s2 = scalar_lea.vmem %s574_s3, 16  ;;  %s2403_s20 = scalar_lea.vmem %s574_s3, 32 }
  0x6d   : > { %p2397_p11 = scmp.ne.s32.totalorder %s574_s3, %s2396_s2  ;;  %p2404_p6 = scmp.lt.s32.totalorder %s574_s3, %s574_s3 }
  0x6e   : > { %p2405_p7 = scmp.lt.s32.totalorder %s2403_s20, %s2396_s2 }
  0x6f   : > { %p2399_p3 = pnand %p2397_p11, %p2767_p1 }
  0x70   : > { %p2406_p9 = por %p2405_p7, %p2404_p6 }
  0x71   : > { %p2400_p5 = pneg %p2399_p3 }
  0x73   : > { %p2407_p12 = pnand %p2406_p9, %p2400_p5 }
  0x75   : > { %2410 = shalt.err (!%p2407_p12)
}
  0x76   : > { %2203 = dma.hbm_to_vmem [thread:$0]  (!%p2753_p13), %s3158_s8, 16, %s574_s3, [#allocation9]  }
  0x77   : > { %s2411_s0 = scalar_lea.hbm %s3161_s11, 256 }
  0x78   : > { %p2412_p0 = scmp.ne.s32.totalorder %s3161_s11, %s2411_s0  ;;  %p2418_p8 = scmp.lt.u32.totalorder %s2411_s0, %s3161_s11 }
  0x7a   : > { %p2414_p2 = pnand %p2412_p0, %p2767_p1 }
  0x7c   : > { %p2415_p4 = pneg %p2414_p2 }
  0x7e   : > { %p2420_p10 = pnand %p2418_p8, %p2415_p4 }
  0x80   : > { %2423 = shalt.err (!%p2420_p10)
}
  0x81   : > { %s2424_s2 = scalar_lea.vmem %s590_s23, 256  ;;  %p2432_p6 = scmp.lt.s32.totalorder %s590_s23, %s590_s23 }
  0x82   : > { %p2425_p11 = scmp.ne.s32.totalorder %s590_s23, %s2424_s2  ;;  %p2433_p7 = scmp.lt.s32.totalorder %s2424_s2, %s2424_s2 }
  0x84   : > { %p2427_p3 = pnand %p2425_p11, %p2767_p1  ;;  %p2434_p9 = por %p2433_p7, %p2432_p6 }
  0x86   : > { %p2428_p5 = pneg %p2427_p3 }
  0x88   : > { %p2435_p12 = pnand %p2434_p9, %p2428_p5 }
  0x8a   : > { %2438 = shalt.err (!%p2435_p12)
}
  0x8b   : > { %s2567_s3 = smov 64   ;;  %s2568_s20 = smov 4  }
  0x8c   : > { %2206 = dma.hbm_to_vmem [thread:$0]  (!%p2753_p13), %s3161_s11, 256, %s590_s23, [#allocation12], %s2567_s3, %s2567_s3, %s2568_s20  }
  0x8d   : > { %p3215_p0 = scmp.ne.s32.totalorder %s3209_s21, 0 }
  0x8e   : > { %p3216_p2 = scmp.ne.s32.totalorder (!%p3215_p0), %s3210_s1, 0 }
  0x8f   : > { %649 = sbr.rel (%p3215_p0) target bundleno = 2695 (0xa87), region = 96 }
  0x96   : > { %2520 = dma.done.wait (%p3216_p2), [#allocation6], 16  }
  0x97   : > { %2522 = vsyncadd (%p3216_p2), [#allocation6], 4294967280 }
  0x98   : > { %2524 = dma.done.wait (%p3216_p2), [#allocation9], 32  }
  0x99   : > { %2526 = vsyncadd (%p3216_p2), [#allocation9], 4294967264 }
  0x9a   : > { %2528 = dma.done.wait (%p3216_p2), [#allocation12], 256  }
  0x9b   : > { %2530 = vsyncadd (%p3216_p2), [#allocation12], 4294967040  ;;  %p733_p13 = scmp.lt.s32.totalorder %s2553_s24, 1  ;;  %v2569_v0 = vmov 0.0   ;;  %vm2570_vm0 = vmmov 0   ;;  %s3217_s23 = sld [smem:[#allocation30_spill]]  ;;  %v966_v47 = vlaneseq }
  0x9c   : > { %2066 = vmatprep.subr.bf16.mxu0 %v2569_v0  ;;  %2070 = vmatprep.mubr.msk.bf16.mxu0 %vm2570_vm0, %v2569_v0  ;;  %s3218_s5 = sld [smem:[#allocation34_spill]]  ;;  %vm777_vm1 = vcmask 261120   ;;  %v2289_v5 = vld [vmem:[%s3157_s7] sm:$0xff]   ;;  %v2290_v6 = vld [vmem:[%s3157_s7 + $0x8] sm:$0xff]   ;;  %s3219_s30 = sld [smem:[#allocation32_spill]]  ;;  %vm885_vm2 = vcmask 257024  }
  0x9d   : > { %s2862_s27 = scalar_select %p733_p13, %s2553_s24, 1  ;;  %2090 = vmatprep.subr.bf16.mxu1 %v2569_v0  ;;  %2092 = vmatprep.mubr.msk.bf16.mxu1 %vm2570_vm0, %v2569_v0  ;;  %v1972_v11 = vld [vmem:[#allocation8] ss:$0 sm:$0xff]  ;;  %v1976_v18 = vld [vmem:[#allocation10] ss:$0 sm:$0xff]  ;;  %vm971_vm3 = vcmask 64512  }
  0x9e   : > { %v1980_v28 = vld [vmem:[#allocation5] ss:$0 sm:$0xff]  ;;  %s2572_s25 = smov 120   ;;  %vm1035_vm4 = vcmask 1043456   ;;  %s2573_s29 = smov 104   ;;  %v967_v49 = vshrl.u32 %v966_v47, 7 }
  0x9f   : > { %s1970_s1 = sshll.u32 %s2862_s27, 3  ;;  %s3221_s2 = sld [smem:[#allocation31_spill]]  ;;  %vm1030_vm6 = vcmask 60416   ;;  %vm1203_vm7 = vcmask 130112   ;;  %vm1321_vm8 = vcmask 195712   ;;  %vm1439_vm9 = vcmask 261312  }
  0xa0   : > { %v968_v50 = vsub.s32 0, %v967_v49  ;;  %s2574_s21 = smov 8   ;;  %s2575_s0 = smov 16  }
  0xa1   : > { %s743_s4 = scalar_lea.vmem %s3217_s23, %s1970_s1  ;;  %s3220_s23 = sld [smem:[#allocation29_spill]] }
  0xa2   : > { %v2287_v1 = vld [vmem:[%s3218_s5] sm:$0xff]   ;;  %v2288_v2 = vld [vmem:[%s3218_s5 + $0x8] sm:$0xff]   ;;  %s3223_s18 = sld [smem:[#allocation39_spill]] }
  0xa3   : > { %2067 = vmatpush3.bf16.msra.mxu0 %v2287_v1  ;;  %v752_v3 = vld [vmem:[%s743_s4] sm:$0xff]  ;;  %v2292_v9 = vld [vmem:[%s3219_s30 + $0x8] sm:$0xff]  }
  0xa4   : > { %2068 = vmatprep.subr.bf16.mxu0 %v2569_v0  ;;  %v753_v4 = vpack.c.bf16 %v752_v3, %v752_v3  ;;  %v2291_v7 = vld [vmem:[%s3219_s30] sm:$0xff]  }
  0xa5   : > { %s746_s3 = scalar_lea.vmem %s3221_s2, %s2862_s27  ;;  %s2960_s27 = sand.u32 1, %s2545_s22  }
  0xa6   : > { %v960_v48 = vld [vmem:[%s746_s3] sm:$0x1]  ;;  %s1969_s20 = sshll.u32 %s2960_s27, 4  ;;  %s1757_s3 = scalar_lea.sflag [#allocation15], %s2960_s27 }
  0xa7   : > { %2069 = vmatpush3.bf16.msra.mxu0 %v2288_v2  ;;  %s739_s4 = scalar_lea.vmem %s3220_s23, %s1970_s1  ;;  %s2571_s1 = smov 112   ;;  %vm961_vm5 = vcmp.eq.f32.partialorder %v960_v48, 0.0 }
  0xa8   : > { %2074 = vmatprep.subr.bf16.mxu0 %v2569_v0  ;;  %v2897_v8 = vld [vmem:[%s739_s4] sm:$0xff]  ;;  %v962_v51 = vsel %vm961_vm5, -1e+09, %v2569_v0  ;;  %s2966_s6 = scalar_lea.vmem [#allocation14], %s1969_s20 }
  0xa9   : > { %v890_v10 = vpack.c.bf16 %v2897_v8, %v2897_v8  ;;  %v969_v52 = vrot.slane %v962_v51, %v968_v50 }
  0xaa   : > { %2071 = vmatmul.mubr.msk.bf16.vlgmr.msra.gmra.mrb[0].mxu0 %vm777_vm1, %v753_v4 }
  0xab   : > { %2075 = vmatpush3.bf16.msra.mxu0 %v2289_v5  ;;  %2078 = vmatprep.mubr.msk.bf16.mxu0 %vm2570_vm0, %v2569_v0 }
  0xac   : > { %2076 = vmatprep.subr.bf16.mxu0 %v2569_v0 }
  0xaf   : > { %2077 = vmatpush3.bf16.msra.mxu0 %v2290_v6 }
  0xb0   : > { %2082 = vmatprep.subr.bf16.mxu0 %v2569_v0 }
  0xb2   : > { %2079 = vmatmul.mubr.msk.bf16.vlgmr.msra.gmra.mrb[4].mxu0 %vm777_vm1, %v753_v4 }
  0xb3   : > { %2083 = vmatpush3.bf16.msra.mxu0 %v2291_v7  ;;  %2086 = vmatprep.mubr.msk.bf16.mxu0 %vm2570_vm0, %v2569_v0 }
  0xb4   : > { %2084 = vmatprep.subr.bf16.mxu0 %v2569_v0 }
  0xb7   : > { %2085 = vmatpush3.bf16.msra.mxu0 %v2292_v9 }
  0xb8   : > { %2096 = vmatprep.subr.bf16.mxu0 %v2569_v0 }
  0xba   : > { %2087 = vmatmul.mubr.msk.bf16.vlgmr.msra.gmra.mrb[8].mxu0 %vm777_vm1, %v890_v10 }
  0xbb   : > { %2098 = vmatprep.mubr.msk.bf16.mxu0 %vm2570_vm0, %v2569_v0 }
 0x17d   : > { %v815_v12 = vpop.f32.mrb[0].mxu0 }
 0x17e   : > { %v816_v13 = vadd.f32 %v1972_v11, %v815_v12  ;;  %v2072_v14 = vpop.f32.mrb[1].mxu0 }
 0x17f   : > { %v818_v15 = vpop.f32.mrb[2].mxu0 }
 0x180   : > { %v884_v16 = vpack.c.bf16 %v816_v13, %v816_v13  ;;  %v2073_v17 = vpop.f32.mrb[3].mxu0 }
 0x182   : > { %886 = vst.msk [vmem:[#allocation2] sm:$0xf] %vm885_vm2, %v884_v16 }
 0x185   : > { %v878_v19 = vpop.f32.mrb[4].mxu0 }
 0x186   : > { %v879_v20 = vadd.f32 %v1976_v18, %v878_v19  ;;  %v2080_v21 = vpop.f32.mrb[5].mxu0 }
 0x187   : > { %v881_v22 = vpop.f32.mrb[6].mxu0 }
 0x188   : > { %v887_v23 = vpack.c.bf16 %v879_v20, %v879_v20  ;;  %v2081_v24 = vpop.f32.mrb[7].mxu0 }
 0x189   : > { %v963_v25 = vld [vmem:[#allocation2] sm:$0xf] }
 0x18a   : > { %888 = vst.msk [vmem:[#allocation3] sm:$0xf] %vm885_vm2, %v887_v23  ;;  %v976_v26 = vsel %vm971_vm3, %v963_v25, 0  ;;  %v1986_v27 = vcombine.low %v963_v25, %v963_v25 }
 0x18b   : > { %2091 = vmatpush3.bf16.xpose.msra.mxu1 %v976_v26 }
 0x18c   : > { %1207 = vrot.lane.b32.xlu1 %v1986_v27, %s2571_s1  ;;  %1086 = vrot.lane.b32.xlu0 %v1986_v27, %s2572_s25 }
 0x18d   : > { %v952_v29 = vpop.f32.mrb[8].mxu0  ;;  %2102 = vmatprep.subr.bf16.mxu1 %v2569_v0 }
 0x18e   : > { %v953_v30 = vadd.f32 %v1980_v28, %v952_v29  ;;  %v2088_v31 = vpop.f32.mrb[9].mxu0 }
 0x18f   : > { %v955_v32 = vpop.f32.mrb[10].mxu0 }
 0x190   : > { %v958_v33 = vmul.f32 0.35355338, %v953_v30  ;;  %v2089_v34 = vpop.f32.mrb[11].mxu0 }
 0x191   : > { %v2915_v35 = vld [vmem:[#allocation3] sm:$0xf] }
 0x192   : > { %v959_v36 = vpack.c.bf16 %v958_v33, %v958_v33  ;;  %v1037_v37 = vsel %vm1035_vm4, %v2915_v35, 0  ;;  %v1989_v20 = vcombine.low %v2915_v35, %v2915_v35 }
 0x193   : > { %2097 = vmatpush3.bf16.msra.mxu0 %v1037_v37 }
 0x194   : > { %1205 = vrot.lane.b32.xlu1 %v959_v36, %s2571_s1  ;;  %1081 = vrot.lane.b32.xlu0 %v959_v36, %s2572_s25 }
 0x195   : > { %2093 = vmatmul.mubr.msk.bf16.vlgmr.msra.gmra.mrb[0].mxu1 %vm971_vm3, %v959_v36  ;;  %2108 = vmatprep.subr.bf16.mxu0 %v2569_v0 }
 0x196   : > { %2104 = vmatprep.mubr.msk.bf16.mxu1 %vm2570_vm0, %v2569_v0 }
 0x198   : > { %1323 = vrot.lane.b32.xlu1 %v959_v36, %s2573_s29  ;;  %1325 = vrot.lane.b32.xlu0 %v1986_v27, %s2573_s29 }
 0x1fe   : > { %v1087_v38 = vpop.permute.xlu0 %1086  ;;  %v1208_v40 = vpop.permute.xlu1 %1207 }
 0x1ff   : > { %v1092_v39 = vsel %vm971_vm3, %v1087_v38, 0  ;;  %v1213_v42 = vsel %vm971_vm3, %v1208_v40, 0 }
 0x200   : > { %2103 = vmatpush3.bf16.xpose.msra.mxu1 %v1092_v39 }
 0x201   : > { %2114 = vmatprep.subr.bf16.mxu1 %v2569_v0 }
 0x206   : > { %v1082_v41 = vpop.permute.xlu0 %1081  ;;  %v1206_v44 = vpop.permute.xlu1 %1205 }
 0x207   : > { %2105 = vmatmul.mubr.msk.bf16.vlgmr.msra.gmra.mrb[4].mxu1 %vm971_vm3, %v1082_v41 }
 0x208   : > { %2115 = vmatpush3.bf16.xpose.msra.mxu1 %v1213_v42  ;;  %2116 = vmatprep.mubr.msk.bf16.mxu1 %vm2570_vm0, %v2569_v0 }
 0x209   : > { %2126 = vmatprep.subr.bf16.mxu1 %v2569_v0 }
 0x20a   : > { %v1326_v43 = vpop.permute.xlu0 %1325  ;;  %v1324_v46 = vpop.permute.xlu1 %1323 }
 0x20b   : > { %v1331_v45 = vsel %vm971_vm3, %v1326_v43, 0 }
 0x20f   : > { %2117 = vmatmul.mubr.msk.bf16.vlgmr.msra.gmra.mrb[8].mxu1 %vm971_vm3, %v1206_v44 }
 0x210   : > { %2127 = vmatpush3.bf16.xpose.msra.mxu1 %v1331_v45  ;;  %2128 = vmatprep.mubr.msk.bf16.mxu1 %vm2570_vm0, %v2569_v0 }
 0x211   : > { %2138 = vmatprep.subr.bf16.mxu1 %v2569_v0 }
 0x217   : > { %2129 = vmatmul.mubr.msk.bf16.vlgmr.msra.gmra.mrb[12].mxu1 %vm971_vm3, %v1324_v46 }
 0x218   : > { %2142 = vmatprep.mubr.msk.bf16.mxu1 %vm2570_vm0, %v2569_v0 }
 0x268   : > { %v1012_v53 = vpop.f32.mrb[0].mxu1 }
 0x269   : > { %v1013_v54 = vadd.f32 %v1012_v53, %v969_v52  ;;  %v2094_v55 = vpop.f32.mrb[1].mxu1 }
 0x26a   : > { %v1015_v56 = vpop.f32.mrb[2].mxu1 }
 0x26b   : > { %v2095_v57 = vpop.f32.mrb[3].mxu1  ;;  %v1018_v58 = vsel %vm971_vm3, %v1013_v54, -inf }
 0x26c   : > { %1019 = vmax.xlane.f32.xlu0 %v1018_v58 }
 0x2da   : > { %v1128_v59 = vpop.f32.mrb[4].mxu1 }
 0x2db   : > { %v1129_v60 = vadd.f32 %v1128_v59, %v969_v52  ;;  %v2106_v61 = vpop.f32.mrb[5].mxu1 }
 0x2dc   : > { %v1131_v62 = vpop.f32.mrb[6].mxu1 }
 0x2dd   : > { %v2107_v63 = vpop.f32.mrb[7].mxu1  ;;  %v1134_v1 = vsel %vm971_vm3, %v1129_v60, -inf }
 0x2de   : > { %1135 = vmax.xlane.f32.xlu1 %v1134_v1 }
 0x2e2   : > { %v1249_v2 = vpop.f32.mrb[8].mxu1 }
 0x2e3   : > { %v1250_v3 = vadd.f32 %v1249_v2, %v969_v52  ;;  %v2118_v4 = vpop.f32.mrb[9].mxu1 }
 0x2e4   : > { %v1252_v5 = vpop.f32.mrb[10].mxu1  ;;  %v2296_v4 = vld [vmem:[%s3159_s9 + $0x8] sm:$0xff]  }
 0x2e5   : > { %v2119_v6 = vpop.f32.mrb[11].mxu1  ;;  %v1255_v7 = vsel %vm971_vm3, %v1250_v3, -inf }
 0x2e6   : > { %1256 = vmax.xlane.f32.xlu0 %v1255_v7 }
 0x2ea   : > { %v1367_v9 = vpop.f32.mrb[12].mxu1 }
 0x2eb   : > { %v1368_v10 = vadd.f32 %v1367_v9, %v969_v52  ;;  %v2130_v11 = vpop.f32.mrb[13].mxu1 }
 0x2ec   : > { %v1370_v12 = vpop.f32.mrb[14].mxu1 }
 0x2ed   : > { %v2131_v13 = vpop.f32.mrb[15].mxu1  ;;  %v1373_v14 = vsel %vm971_vm3, %v1368_v10, -inf }
 0x2ee   : > { %1374 = vmax.xlane.f32.xlu0 %v1373_v14 }
 0x2f9   : > { %v1020_v15 = vpop.xlane.xlu0 %1019 }
 0x2fa   : > { %v1021_v16 = vsub.f32 %v1013_v54, %v1020_v15 }
 0x2fc   : > { %v1022_v17 = vmul.f32 1.442695, %v1021_v16 }
 0x2fe   : > { %2307 = vpow2.f32 %v1022_v17 }
 0x308   : > { %v2308_v18 = vpop.eup %2307 }
 0x309   : > { %v1024_v19 = vsel %vm971_vm3, %v2308_v18, 0.0 }
 0x30a   : > { %1025 = vadd.xlane.f32.xlu1 %v1024_v19  ;;  %v1997_v19 = vld [vmem:[%s3160_s10] ss:$0 sm:$0xff] }
 0x31b   : > { %1151 = vrot.lane.b32.xlu1 %v1989_v20, %s2572_s25  ;;  %s2025_s25 = sshll.u32 %s2553_s24, 8 }
 0x31c   : > { %s3064_s2 = scalar_lea.hbm %s3223_s18, %s2025_s25 }
 0x36b   : > { %v1136_v21 = vpop.xlane.xlu1 %1135 }
 0x36c   : > { %v1137_v22 = vsub.f32 %v1129_v60, %v1136_v21 }
 0x36e   : > { %v1138_v23 = vmul.f32 1.442695, %v1137_v22 }
 0x370   : > { %2309 = vpow2.f32 %v1138_v23 }
 0x373   : > { %v1257_v24 = vpop.xlane.xlu0 %1256 }
 0x374   : > { %v1258_v25 = vsub.f32 %v1250_v3, %v1257_v24  ;;  %v2295_v3 = vld [vmem:[%s3159_s9] sm:$0xff]  }
 0x375   : > { %2139 = vmatpush3.bf16.msra.mxu1 %v2295_v3 }
 0x376   : > { %v1259_v26 = vmul.f32 1.442695, %v1258_v25  ;;  %2140 = vmatprep.subr.bf16.mxu1 %v2569_v0 }
 0x378   : > { %2311 = vpow2.f32 %v1259_v26 }
 0x379   : > { %2141 = vmatpush3.bf16.msra.mxu1 %v2296_v4 }
 0x37a   : > { %v2310_v27 = vpop.eup %2309  ;;  %2154 = vmatprep.subr.bf16.mxu1 %v2569_v0 }
 0x37b   : > { %v1375_v28 = vpop.xlane.xlu0 %1374  ;;  %v1140_v29 = vsel %vm971_vm3, %v2310_v27, 0.0 }
 0x37c   : > { %v1376_v30 = vsub.f32 %v1368_v10, %v1375_v28  ;;  %1141 = vadd.xlane.f32.xlu0 %v1140_v29 }
 0x37e   : > { %v1377_v31 = vmul.f32 1.442695, %v1376_v30 }
 0x380   : > { %2313 = vpow2.f32 %v1377_v31 }
 0x382   : > { %v2312_v32 = vpop.eup %2311 }
 0x383   : > { %v1261_v33 = vsel %vm971_vm3, %v2312_v32, 0.0 }
 0x384   : > { %1262 = vadd.xlane.f32.xlu1 %v1261_v33  ;;  %v2298_v33 = vld [vmem:[#allocation11 + $0x8] sm:$0xff]  }
 0x38a   : > { %v2314_v34 = vpop.eup %2313 }
 0x38b   : > { %v1379_v35 = vsel %vm971_vm3, %v2314_v34, 0.0 }
 0x38c   : > { %1380 = vadd.xlane.f32.xlu0 %v1379_v35  ;;  %v2301_v35 = vld [vmem:[%s3163_s13 + $0x10] sm:$0xff]  }
 0x395   : > { %1387 = vrot.lane.b32.xlu1 %v1989_v20, %s2573_s29 }
 0x397   : > { %v1026_v36 = vpop.xlane.xlu1 %1025 }
 0x398   : > { %2315 = vrcp.f32 %v1026_v36  ;;  %v2302_v36 = vld [vmem:[%s3163_s13 + $0x18] sm:$0xff]  }
 0x39b   : > { %v1152_v39 = vpop.permute.xlu1 %1151 }
 0x39c   : > { %v1157_v41 = vsel %vm1035_vm4, %v1152_v39, 0 }
 0x3a2   : > { %v2316_v37 = vpop.eup %2315  ;;  %1269 = vrot.lane.b32.xlu0 %v1989_v20, %s2571_s1  ;;  %s2576_s1 = smov 24  }
 0x3a3   : > { %v1028_v38 = vmul.f32 %v2316_v37, %v2308_v18  ;;  %v2303_v37 = vld [vmem:[%s3163_s13 + $0x20] sm:$0xff]  }
 0x3a5   : > { %v1029_v40 = vpack.c.bf16 %v1028_v38, %v1028_v38  ;;  %v2304_v38 = vld [vmem:[%s3163_s13 + $0x28] sm:$0xff]  }
 0x3a7   : > { %2099 = vmatmul.mubr.msk.bf16.vlgmr.msra.gmra.mrb[12].mxu0 %vm971_vm3, %v1029_v40  ;;  %1031 = vst.msk [vmem:[%s2966_s6] sm:$0xf] %vm1030_vm6, %v1029_v40 }
 0x3a8   : > { %2109 = vmatpush3.bf16.msra.mxu0 %v1157_v41  ;;  %2110 = vmatprep.mubr.msk.bf16.mxu0 %vm2570_vm0, %v2569_v0 }
 0x3a9   : > { %2120 = vmatprep.subr.bf16.mxu0 %v2569_v0 }
 0x409   : > { %v1142_v42 = vpop.xlane.xlu0 %1141 }
 0x40a   : > { %2317 = vrcp.f32 %v1142_v42 }
 0x411   : > { %v1263_v43 = vpop.xlane.xlu1 %1262 }
 0x412   : > { %2319 = vrcp.f32 %v1263_v43  ;;  %v2001_v43 = vld [vmem:[%s3165_s15] ss:$0 sm:$0xff] }
 0x414   : > { %v2318_v44 = vpop.eup %2317 }
 0x415   : > { %v1144_v45 = vmul.f32 %v2318_v44, %v2310_v27  ;;  %v1388_v52 = vpop.permute.xlu1 %1387 }
 0x416   : > { %v1393_v54 = vsel %vm1035_vm4, %v1388_v52, 0 }
 0x417   : > { %v1145_v46 = vpack.c.bf16 %v1144_v45, %v1144_v45  ;;  %v2002_v45 = vld [vmem:[%s3166_s16] ss:$0 sm:$0xff] }
 0x419   : > { %2111 = vmatmul.mubr.msk.bf16.vlgmr.msra.gmra.mrb[16].mxu0 %vm971_vm3, %v1145_v46  ;;  %v1381_v47 = vpop.xlane.xlu0 %1380  ;;  %1988 = vst.msk [vmem:[%s2966_s6 + $0x4] sm:$0xf] %vm1030_vm6, %v1145_v46 }
 0x41a   : > { %2321 = vrcp.f32 %v1381_v47  ;;  %2122 = vmatprep.mubr.msk.bf16.mxu0 %vm2570_vm0, %v2569_v0 }
 0x41c   : > { %v2320_v48 = vpop.eup %2319 }
 0x41d   : > { %v1265_v49 = vmul.f32 %v2320_v48, %v2312_v32  ;;  %v1270_v50 = vpop.permute.xlu0 %1269  ;;  %v2297_v32 = vld [vmem:[#allocation11] sm:$0xff]  }
 0x41e   : > { %v1275_v51 = vsel %vm1035_vm4, %v1270_v50, 0  ;;  %v2306_v50 = vld [vmem:[%s3163_s13 + $0x38] sm:$0xff]  }
 0x41f   : > { %2121 = vmatpush3.bf16.msra.mxu0 %v1275_v51  ;;  %v1266_v53 = vpack.c.bf16 %v1265_v49, %v1265_v49  ;;  %v2305_v49 = vld [vmem:[%s3163_s13 + $0x30] sm:$0xff]   ;;  %v2003_v51 = vld [vmem:[%s3162_s12] ss:$0 sm:$0xff] }
 0x420   : > { %2132 = vmatprep.subr.bf16.mxu0 %v2569_v0 }
 0x421   : > { %1992 = vst.msk [vmem:[%s2966_s6 + $0x8] sm:$0xf] %vm1030_vm6, %v1266_v53 }
 0x422   : > { %2123 = vmatmul.mubr.msk.bf16.vlgmr.msra.gmra.mrb[20].mxu0 %vm971_vm3, %v1266_v53 }
 0x423   : > { %2133 = vmatpush3.bf16.msra.mxu0 %v1393_v54  ;;  %2134 = vmatprep.mubr.msk.bf16.mxu0 %vm2570_vm0, %v2569_v0 }
 0x424   : > { %v2322_v55 = vpop.eup %2321  ;;  %2146 = vmatprep.subr.bf16.mxu0 %v2569_v0 }
 0x425   : > { %v1383_v56 = vmul.f32 %v2322_v55, %v2314_v34  ;;  %v2300_v34 = vld [vmem:[%s3163_s13 + $0x8] sm:$0xff]  }
 0x427   : > { %v1384_v57 = vpack.c.bf16 %v1383_v56, %v1383_v56 }
 0x429   : > { %1995 = vst.msk [vmem:[%s2966_s6 + $0xc] sm:$0xf] %vm1030_vm6, %v1384_v57 }
 0x42a   : > { %2135 = vmatmul.mubr.msk.bf16.vlgmr.msra.gmra.mrb[24].mxu0 %vm971_vm3, %v1384_v57 }
 0x42b   : > { %2150 = vmatprep.mubr.msk.bf16.mxu0 %vm2570_vm0, %v2569_v0  ;;  %2147 = vmatpush3.bf16.msra.mxu0 %v2297_v32 }
 0x42c   : > { %2148 = vmatprep.subr.bf16.mxu0 %v2569_v0 }
 0x42f   : > { %2149 = vmatpush3.bf16.msra.mxu0 %v2298_v33 }
 0x47a   : > { %v1073_v58 = vpop.f32.mrb[12].mxu0 }
 0x47b   : > { %1079 = vst.msk [vmem:[#allocation4] sm:$0xff] %vm971_vm3, %v1073_v58  ;;  %v2100_v59 = vpop.f32.mrb[13].mxu0 }
 0x47c   : > { %v1076_v60 = vpop.f32.mrb[14].mxu0 }
 0x47d   : > { %v2101_v61 = vpop.f32.mrb[15].mxu0 }
 0x4ec   : > { %v1193_v62 = vpop.f32.mrb[16].mxu0 }
 0x4ed   : > { %1200 = vrot.lane.b32.xlu1 %v1193_v62, %s2574_s21  ;;  %v2112_v63 = vpop.f32.mrb[17].mxu0  ;;  %s2577_s21 = smov [#allocation14]  }
 0x4ee   : > { %v1196_v1 = vpop.f32.mrb[18].mxu0  ;;  %s2443_s26 = sshll.u32 %s2577_s21, 4  ;;  %s2444_s26 = int_to_ptr.vmem [resolvable:$false] %s2443_s26 }
 0x4ef   : > { %v2113_v2 = vpop.f32.mrb[19].mxu0 }
 0x4f5   : > { %v1311_v5 = vpop.f32.mrb[20].mxu0 }
 0x4f6   : > { %1318 = vrot.lane.b32.xlu0 %v1311_v5, %s2575_s0  ;;  %v2124_v6 = vpop.f32.mrb[21].mxu0  ;;  %s3222_s0 = sld [smem:[#allocation26_spill]] }
 0x4f7   : > { %v1314_v7 = vpop.f32.mrb[22].mxu0 }
 0x4f8   : > { %v2125_v9 = vpop.f32.mrb[23].mxu0 }
 0x4fc   : > { %p3224_p4 = scmp.ne.s32.totalorder %s3222_s0, 0 }
 0x4fd   : > { %v1429_v10 = vpop.f32.mrb[24].mxu0 }
 0x4fe   : > { %1436 = vrot.lane.b32.xlu1 %v1429_v10, %s2576_s1  ;;  %v2136_v11 = vpop.f32.mrb[25].mxu0  ;;  %s1785_s1 = sshll.u32 %s2966_s6, 4  ;;  %s2445_s6 = scalar_lea.vmem %s2444_s26, 512  ;;  %s3059_s1 = int_to_ptr.vmem [resolvable:$true] %s1785_s1 }
 0x4ff   : > { %v1432_v12 = vpop.f32.mrb[26].mxu0  ;;  %s2439_s20 = scalar_lea.vmem %s3059_s1, 256  ;;  %p2446_p11 = scmp.lt.s32.totalorder %s3059_s1, %s2444_s26 }
 0x500   : > { %v2137_v13 = vpop.f32.mrb[27].mxu0  ;;  %p2440_p1 = scmp.ne.s32.totalorder %s3059_s1, %s2439_s20  ;;  %p2447_p3 = scmp.lt.s32.totalorder %s2445_s6, %s2439_s20 }
 0x502   : > { %p2441_p8 = pnand %p2440_p1, %p3224_p4  ;;  %p2448_p5 = por %p2447_p3, %p2446_p11 }
 0x504   : > { %p2442_p10 = pneg %p2441_p8 }
 0x506   : > { %p2449_p6 = pnand %p2448_p5, %p2442_p10 }
 0x55f   : > { %v1201_v14 = vpop.permute.xlu1 %1200 }
 0x560   : > { %1204 = vst.msk [vmem:[#allocation4] sm:$0xff] %vm1203_vm7, %v1201_v14 }
 0x568   : > { %v1319_v15 = vpop.permute.xlu0 %1318 }
 0x569   : > { %1322 = vst.msk [vmem:[#allocation4] sm:$0xff] %vm1321_vm8, %v1319_v15 }
 0x570   : > { %v1437_v16 = vpop.permute.xlu1 %1436 }
 0x571   : > { %1440 = vst.msk [vmem:[#allocation4] sm:$0xff] %vm1439_vm9, %v1437_v16 }
 0x578   : > { %v1441_v17 = vld [vmem:[#allocation4] sm:$0xff] }
 0x579   : > { %v1442_v18 = vpack.c.bf16 %v1441_v17, %v1441_v17 }
 0x57b   : > { %2143 = vmatmul.mubr.msk.bf16.vlgmr.msra.gmra.mrb[16].mxu1 %vm777_vm1, %v1442_v18 }
 0x57c   : > { %2170 = vmatprep.mubr.msk.bf16.mxu1 %vm2570_vm0, %v2569_v0 }
 0x64e   : > { %v1503_v20 = vpop.f32.mrb[16].mxu1 }
 0x64f   : > { %v1504_v21 = vadd.f32 %v1997_v19, %v1503_v20  ;;  %v2144_v22 = vpop.f32.mrb[17].mxu1 }
 0x650   : > { %v1506_v23 = vpop.f32.mrb[18].mxu1 }
 0x651   : > { %v2145_v24 = vpop.f32.mrb[19].mxu1  ;;  %v1509_v25 = vadd.f32 %v1504_v21, %v2897_v8  ;;  %v2299_v8 = vld [vmem:[%s3163_s13] sm:$0xff]  }
 0x652   : > { %2155 = vmatpush3.bf16.msra.mxu1 %v2299_v8 }
 0x653   : > { %v1512_v26 = vsel %vm777_vm1, %v1509_v25, 0.0  ;;  %2156 = vmatprep.subr.bf16.mxu1 %v2569_v0 }
 0x654   : > { %1513 = vadd.xlane.f32.xlu0 %v1512_v26 }
 0x656   : > { %2157 = vmatpush3.bf16.msra.mxu1 %v2300_v34 }
 0x657   : > { %2158 = vmatprep.subr.bf16.mxu1 %v2569_v0 }
 0x65a   : > { %2159 = vmatpush3.bf16.msra.mxu1 %v2301_v35 }
 0x65b   : > { %2160 = vmatprep.subr.bf16.mxu1 %v2569_v0 }
 0x65e   : > { %2161 = vmatpush3.bf16.msra.mxu1 %v2302_v36 }
 0x65f   : > { %2162 = vmatprep.subr.bf16.mxu1 %v2569_v0 }
 0x662   : > { %2163 = vmatpush3.bf16.msra.mxu1 %v2303_v37 }
 0x663   : > { %2164 = vmatprep.subr.bf16.mxu1 %v2569_v0 }
 0x666   : > { %2165 = vmatpush3.bf16.msra.mxu1 %v2304_v38 }
 0x667   : > { %2166 = vmatprep.subr.bf16.mxu1 %v2569_v0 }
 0x66a   : > { %2167 = vmatpush3.bf16.msra.mxu1 %v2305_v49 }
 0x66b   : > { %2168 = vmatprep.subr.bf16.mxu1 %v2569_v0  ;;  %v2007_v0 = vld [vmem:[%s3164_s14] ss:$0 sm:$0xff] }
 0x66e   : > { %2169 = vmatpush3.bf16.msra.mxu1 %v2306_v50 }
 0x6e1   : > { %v1514_v27 = vpop.xlane.xlu0 %1513 }
 0x6e2   : > { %v1516_v28 = vmul.f32 0.03125, %v1514_v27 }
 0x6e4   : > { %v1517_v29 = vsub.f32 %v1509_v25, %v1516_v28 }
 0x6e6   : > { %v1518_v30 = vmul.f32 %v1517_v29, %v1517_v29 }
 0x6e8   : > { %v1519_v31 = vsel %vm777_vm1, %v1518_v30, 0.0 }
 0x6e9   : > { %1520 = vadd.xlane.f32.xlu1 %v1519_v31 }
 0x776   : > { %v1521_v39 = vpop.xlane.xlu1 %1520 }
 0x777   : > { %v1522_v40 = vmul.f32 0.03125, %v1521_v39 }
 0x779   : > { %v1523_v41 = vadd.f32 1e-05, %v1522_v40 }
 0x77b   : > { %2323 = vrsqrt.f32 %v1523_v41 }
 0x785   : > { %v2324_v42 = vpop.eup %2323 }
 0x786   : > { %v1525_v44 = vmul.f32 %v2324_v42, %v1517_v29 }
 0x788   : > { %v1532_v46 = vmul.f32 %v2001_v43, %v1525_v44 }
 0x78a   : > { %v1539_v47 = vadd.f32 %v2002_v45, %v1532_v46 }
 0x78c   : > { %v1540_v48 = vpack.c.bf16 %v1539_v47, %v1539_v47 }
 0x78e   : > { %2151 = vmatmul.mubr.msk.bf16.vlgmr.msra.gmra.mrb[28].mxu0 %vm777_vm1, %v1540_v48 }
 0x861   : > { %v1601_v52 = vpop.f32.mrb[28].mxu0 }
 0x862   : > { %v1602_v53 = vadd.f32 %v2003_v51, %v1601_v52  ;;  %v2152_v54 = vpop.f32.mrb[29].mxu0 }
 0x863   : > { %v1604_v55 = vpop.f32.mrb[30].mxu0 }
 0x864   : > { %v1607_v56 = vmax.f32 %v1602_v53, 0.0  ;;  %v2153_v57 = vpop.f32.mrb[31].mxu0 }
 0x866   : > { %v1608_v58 = vpack.c.bf16 %v1607_v56, %v1607_v56 }
 0x868   : > { %2171 = vmatmul.mubr.bf16.vlgmr.msra.gmra.mrb[20].mxu1 %v1608_v58 }
 0x93b   : > { %v1714_v59 = vpop.f32.mrb[20].mxu1 }
 0x93c   : > { %v1715_v60 = vadd.f32 %v2007_v0, %v1714_v59  ;;  %v2172_v61 = vpop.f32.mrb[21].mxu1 }
 0x93d   : > { %v1717_v62 = vpop.f32.mrb[22].mxu1 }
 0x93e   : > { %v2173_v63 = vpop.f32.mrb[23].mxu1  ;;  %v1720_v1 = vadd.f32 %v1715_v60, %v1539_v47 }
 0x940   : > { %v1723_v2 = vsel %vm777_vm1, %v1720_v1, 0.0 }
 0x941   : > { %1724 = vadd.xlane.f32.xlu0 %v1723_v2 }
 0x9ce   : > { %v1725_v3 = vpop.xlane.xlu0 %1724 }
 0x9cf   : > { %v1726_v4 = vmul.f32 0.03125, %v1725_v3 }
 0x9d1   : > { %v1727_v5 = vsub.f32 %v1720_v1, %v1726_v4 }
 0x9d3   : > { %v1728_v6 = vmul.f32 %v1727_v5, %v1727_v5 }
 0x9d5   : > { %v1729_v7 = vsel %vm777_vm1, %v1728_v6, 0.0 }
 0x9d6   : > { %1730 = vadd.xlane.f32.xlu0 %v1729_v7 }
 0x9d7   : > { %2452 = shalt.err (!%p2449_p6)
}
 0x9d8   : > { %s2453_s23 = scalar_lea.hbm %s3064_s2, 256  ;;  %s2457_s25 = scalar_lea.hbm %s3223_s18, 512 }
 0x9d9   : > { %p2454_p7 = scmp.ne.s32.totalorder %s3064_s2, %s2453_s23  ;;  %p2458_p0 = scmp.lt.u32.totalorder %s3064_s2, %s3223_s18 }
 0x9da   : > { %p2459_p2 = scmp.lt.u32.totalorder %s2457_s25, %s2453_s23  ;;  %p2461_p1 = scmp.lt.u32.totalorder %s2453_s23, %s3064_s2 }
 0x9db   : > { %p2455_p9 = pnand %p2454_p7, %p3224_p4 }
 0x9dc   : > { %p2460_p13 = por %p2459_p2, %p2458_p0 }
 0x9dd   : > { %p2456_p12 = pneg %p2455_p9 }
 0x9de   : > { %p2462_p8 = por %p2461_p1, %p2460_p13 }
 0x9e0   : > { %p2463_p10 = pnand %p2462_p8, %p2456_p12 }
 0x9e2   : > { %2466 = shalt.err (!%p2463_p10)
}
 0x9e3   : > { %s2578_s20 = smov 64   ;;  %s2579_s21 = smov 4  }
 0x9e4   : > { %2191 = dma.vmem_to_hbm [thread:$0]  (%p3224_p4), %s3059_s1, 256, %s3064_s2, %s1757_s3, %s2578_s20, %s2578_s20, %s2579_s21  }
 0x9e5   : > { %s1968_s26 = sshll.u32 %s2960_s27, 3  ;;  %s3225_s4 = sld [smem:[#allocation36_spill]] }
 0x9e6   : > { %s3226_s29 = sld [smem:[#allocation37_spill]]  ;;  %s2020_s17 = sshll.u32 %s2553_s24, 7 }
 0x9e7   : > { %s725_s5 = scalar_lea.vmem [#allocation13], %s1968_s26  ;;  %s3227_s20 = sld [smem:[#allocation38_spill]] }
 0x9e8   : > { %s1771_s1 = sshll.u32 %s725_s5, 4  ;;  %s1752_s6 = scalar_lea.sflag [#allocation7], %s2960_s27  ;;  %s3103_s1 = int_to_ptr.vmem [resolvable:$true] %s1771_s1 }
 0x9e9   : > { %s2467_s23 = scalar_lea.vmem %s3103_s1, 128  ;;  %s2580_s24 = smov [#allocation13]  }
 0x9ea   : > { %p2468_p11 = scmp.ne.s32.totalorder %s3103_s1, %s2467_s23  ;;  %s2471_s26 = sshll.u32 %s2580_s24, 4  ;;  %s2472_s26 = int_to_ptr.vmem [resolvable:$false] %s2471_s26 }
 0x9eb   : > { %v2016_v13 = vld [vmem:[%s3225_s4] ss:$0 sm:$0xff]  ;;  %s2473_s4 = scalar_lea.vmem %s2472_s26, 256  ;;  %p2474_p6 = scmp.lt.s32.totalorder %s3103_s1, %s2472_s26 }
 0x9ec   : > { %v2017_v15 = vld [vmem:[%s3226_s29] ss:$0 sm:$0xff]  ;;  %p2469_p3 = pnand %p2468_p11, %p3224_p4  ;;  %p2475_p7 = scmp.lt.s32.totalorder %s2473_s4, %s2467_s23 }
 0x9ed   : > { %s3101_s21 = scalar_lea.hbm %s3227_s20, %s2020_s17 }
 0x9ee   : > { %p2470_p5 = pneg %p2469_p3  ;;  %p2476_p9 = por %p2475_p7, %p2474_p6 }
 0x9f0   : > { %p2477_p12 = pnand %p2476_p9, %p2470_p5 }
 0xa63   : > { %v1731_v9 = vpop.xlane.xlu0 %1730 }
 0xa64   : > { %v1732_v10 = vmul.f32 0.03125, %v1731_v9 }
 0xa66   : > { %v1733_v11 = vadd.f32 1e-05, %v1732_v10 }
 0xa68   : > { %2325 = vrsqrt.f32 %v1733_v11 }
 0xa72   : > { %v2326_v12 = vpop.eup %2325 }
 0xa73   : > { %v1735_v14 = vmul.f32 %v2326_v12, %v1727_v5 }
 0xa75   : > { %v1742_v16 = vmul.f32 %v2016_v13, %v1735_v14 }
 0xa77   : > { %v1749_v17 = vadd.f32 %v2017_v15, %v1742_v16 }
 0xa79   : > { %1750 = vst.msk [vmem:[%s725_s5] sm:$0xff] %vm777_vm1, %v1749_v17 }
 0xa7a   : > { %2480 = shalt.err (!%p2477_p12)
}
 0xa7b   : > { %s2481_s5 = scalar_lea.hbm %s3101_s21, 128  ;;  %s2485_s25 = scalar_lea.hbm %s3227_s20, 256 }
 0xa7c   : > { %p2482_p0 = scmp.ne.s32.totalorder %s3101_s21, %s2481_s5  ;;  %p2486_p1 = scmp.lt.u32.totalorder %s3101_s21, %s3227_s20 }
 0xa7d   : > { %p2487_p8 = scmp.lt.u32.totalorder %s2485_s25, %s2481_s5  ;;  %p2489_p11 = scmp.lt.u32.totalorder %s2481_s5, %s3101_s21 }
 0xa7e   : > { %p2483_p2 = pnand %p2482_p0, %p3224_p4 }
 0xa7f   : > { %p2488_p10 = por %p2487_p8, %p2486_p1 }
 0xa80   : > { %p2484_p13 = pneg %p2483_p2 }
 0xa81   : > { %p2490_p3 = por %p2489_p11, %p2488_p10 }
 0xa83   : > { %p2491_p5 = pnand %p2490_p3, %p2484_p13 }
 0xa85   : > { %2494 = shalt.err (!%p2491_p5)
}
 0xa86   : > { %2190 = dma.vmem_to_hbm [thread:$0]  (%p3224_p4), %s3103_s1, 128, %s3101_s21, %s1752_s6  }
 0xa87 PF: > { %s3228_s2 = sld [smem:[#allocation24_spill]]  ;;  %s3229_s3 = sld [smem:[#allocation21_spill]] }
 0xa88   : > { %s3230_s23 = sld [smem:[#allocation27_spill]] }
 0xa8d   : > { %p2222_p6 = scmp.ge.s32.totalorder %s3228_s2, 2  ;;  %s1800_s24 = sand.u32 1, %s3229_s3  }
 0xa8e   : > { %p3231_p7 = scmp.ne.s32.totalorder %s3230_s23, 0  ;;  %s1801_s26 = scalar_lea.sflag [#allocation7], %s1800_s24 }
 0xa90   : > { %p2208_p9 = pnand %p2222_p6, %p3231_p7 }
 0xa92   : > { %2532 = dma.done.wait (!%p2208_p9), %s1801_s26, 128  }
 0xa93   : > { %2534 = vsyncadd (!%p2208_p9), %s1801_s26, 4294967168  ;;  %s1810_s4 = scalar_lea.sflag [#allocation15], %s1800_s24 }
 0xa94   : > { %2536 = dma.done.wait (!%p2208_p9), %s1810_s4, 256  }
 0xa95   : > { %2538 = vsyncadd (!%p2208_p9), %s1810_s4, 4294967040  ;;  %s40_s25 = sadd.s32 1, %s3228_s2   ;;  %s3232_s0 = sld [smem:[#allocation22_spill]] }
 0xa96   : > { %p37_p12 = scmp.ge.s32.totalorder %s40_s25, 4   ;;  %s3233_s23 = sld [smem:[#allocation28_spill]] }
 0xa97   : > { %s3234_s24 = sld [smem:[#allocation23_spill]]  ;;  %s3235_s2 = sld [smem:[#allocation25_spill]] }
 0xa98   : > { %s3236_s1 = smov %s2545_s22  ;;  %39 = sbr.rel (!%p37_p12) target bundleno = 21 (0x15), region = 178 }
 0xa9b   : > { %s3237_s22 = smov %s3232_s0 }
 0xa9f   :  { %1815 = vsyncpa [#allocation6], 1 }
 0xaa0   :  { %1817 = vsyncpa [#allocation6 + $0x1], 1 }
 0xaa1   :  { %1818 = vsyncpa [#allocation9], 1 }
 0xaa2   :  { %1819 = vsyncpa [#allocation12], 1 }
 0xaa3   :  { %1820 = vsyncpa [#allocation7], 1 }
 0xaa4   :  { %1822 = vsyncpa [#allocation7 + $0x1], 1 }
 0xaa5   :  { %1823 = vsyncpa [#allocation15], 1 }
 0xaa6   :  { %1825 = vsyncpa [#allocation15 + $0x1], 1 }

</bundles_post_ra>
